<compile_context>
chip_gen: v5e
topology: v5e:2x2
jax: 0.10.0
libtpu: 0.0.40
codegen_flags: <defaults>
</compile_context>

<pallas_src>
import functools

import jax
import jax.numpy as jnp
from jax.experimental import pallas as pl
from jax.experimental.pallas import tpu as pltpu

LANE = 128  # lane-dense padding multiple for matmul N dims / output slab


def _round_up(n, m):
    return ((n + m - 1) // m) * m


# ----------------------------- Pallas kernel ------------------------------ #

def _swav_kernel(*refs, predict, tile_h, width, c2, c3, k):
    """One (batch, h-tile) grid step.

    Refs (in order):
      xa_ref : (1, tile_h, W+2, Cinp) bf16   current rows of the padded image
      xb_ref : (1, 2,      W+2, Cinp) bf16   bottom halo (next 2 padded rows)
      wb_ref : (9, Cinp, C1p) bf16           3x3 conv weight, one slab per tap
      bb_ref : (1, C1p) f32
      wh_ref : (C1p, C2p) bf16 ; bh_ref : (1, C2p) f32
      wp_ref : (C2p, C3p) bf16 ; bp_ref : (1, C3p) f32
      wk_ref : (C3p, Kp)  bf16               (predict=True only)
      out_ref: (tile_h*W, SLAB) bf16         [rep(:c2)|proj(:c3)|sim(:k)|0...]
    """
    if predict:
        (xa_ref, xb_ref, wb_ref, bb_ref, wh_ref, bh_ref, wp_ref, bp_ref,
         wk_ref, out_ref) = refs
    else:
        (xa_ref, xb_ref, wb_ref, bb_ref, wh_ref, bh_ref, wp_ref, bp_ref,
         out_ref) = refs

    f32 = jnp.float32
    bf16 = jnp.bfloat16
    cinp = wb_ref.shape[1]
    m = tile_h * width

    # Fused im2col: the (tile_h + 2)-row halo window only ever lives in VMEM.
    # Top halo is the zero row the wrapper pre-pads; bottom halo comes from
    # the 2-row xb block.
    win = jnp.concatenate([xa_ref[0], xb_ref[0]], axis=0)  # (tile_h+2, W+2, Cinp)

    # backbone: 3x3 conv (pad=1) as 9 shifted accumulate-matmuls, then ReLU.
    acc = None
    for dy in range(3):
        for dx in range(3):
            patch = win[dy:dy + tile_h, dx:dx + width, :].reshape(m, cinp)
            part = jnp.dot(patch, wb_ref[dy * 3 + dx],
                           preferred_element_type=f32)
            acc = part if acc is None else acc + part
    feat = jnp.maximum(acc + bb_ref[...], 0.0)

    # sem_seg_head: 1x1 conv + ReLU -> representation.
    rep = jnp.dot(feat.astype(bf16), wh_ref[...], preferred_element_type=f32)
    rep = jnp.maximum(rep + bh_ref[...], 0.0)

    # projector: 1x1 conv -> projection.
    proj = jnp.dot(rep.astype(bf16), wp_ref[...], preferred_element_type=f32)
    proj = proj + bp_ref[...]

    # Pack only the real channel widths into one lane-dense bf16 slab so the
    # HBM writeback is a single dense stream.
    out_ref[...] = jnp.zeros(out_ref.shape, out_ref.dtype)
    out_ref[:, 0:c2] = rep[:, :c2].astype(out_ref.dtype)

    if predict:
        # F.normalize(projection, dim=1, p=2): padded channels are exact zeros
        # so the norm is unaffected; rsqrt runs on the (otherwise idle) EUP.
        sumsq = jnp.sum(proj * proj, axis=-1, keepdims=True)
        proj = proj * jax.lax.rsqrt(jnp.maximum(sumsq, 1e-24))
        # prototypes: 1x1 conv, no bias -> similarity.
        sim = jnp.dot(proj.astype(bf16), wk_ref[...], preferred_element_type=f32)
        out_ref[:, c2:c2 + c3] = proj[:, :c3].astype(out_ref.dtype)
        out_ref[:, c2 + c3:c2 + c3 + k] = sim[:, :k].astype(out_ref.dtype)
    else:
        out_ref[:, c2:c2 + c3] = proj[:, :c3].astype(out_ref.dtype)


def _swav_pallas(xpad, wb, bb, wh, bh, wp, bp, wk, *, predict, tile_h,
                 batch, he, width, c2, c3, k):
    nh = he // tile_h
    _, hp, wp2, cinp = xpad.shape
    c1p = wb.shape[2]
    c2p = wh.shape[1]
    c3p = wp.shape[1]
    kp = wk.shape[1]
    tile_m = tile_h * width
    slab = _round_up(c2 + c3 + (k if predict else 0), LANE)
    n_rows = batch * he * width
    assert hp == he + tile_h and tile_m % 8 == 0 and tile_h % 2 == 0

    def resident(shape):
        # Grid-invariant operand: single-buffer it (double buffering would
        # only double its VMEM footprint for zero pipelining benefit; matters
        # at real SwAV channel counts on v7x's 64 MiB part).
        return pl.BlockSpec(shape, lambda bi, hi: (0,) * len(shape),
                            pipeline_mode=pl.Buffered(1))

    in_specs = [
        # current tile_h rows of the spatially padded NHWC input
        pl.BlockSpec((1, tile_h, wp2, cinp), lambda bi, hi: (bi, hi, 0, 0)),
        # 2-row bottom halo (block granularity 2 along padded H)
        pl.BlockSpec((1, 2, wp2, cinp),
                     lambda bi, hi: (bi, (hi + 1) * (tile_h // 2), 0, 0)),
        resident((9, cinp, c1p)),   # wb
        resident((1, c1p)),         # bb
        resident((c1p, c2p)),       # wh
        resident((1, c2p)),         # bh
        resident((c2p, c3p)),       # wp
        resident((1, c3p)),         # bp
    ]
    args = [xpad, xpad, wb, bb, wh, bh, wp, bp]
    if predict:
        in_specs.append(resident((c3p, kp)))
        args.append(wk)

    kernel = functools.partial(_swav_kernel, predict=predict, tile_h=tile_h,
                               width=width, c2=c2, c3=c3, k=k)

    return pl.pallas_call(
        kernel,
        out_shape=jax.ShapeDtypeStruct((n_rows, slab), jnp.bfloat16),
        grid_spec=pltpu.PrefetchScalarGridSpec(
            num_scalar_prefetch=0,
            grid=(batch, nh),
            in_specs=in_specs,
            out_specs=pl.BlockSpec((tile_m, slab),
                                   lambda bi, hi: (bi * nh + hi, 0)),
        ),
        # Both grid axes write disjoint output tiles -> megacore sharding.
        compiler_params=pltpu.CompilerParams(
            dimension_semantics=("parallel", "parallel"),
            # Explicit scoped-VMEM ceiling with headroom; re-derive tile_h for
            # real SwAV dims on v7x (64 MiB physical / 32 MiB scoped default).
            vmem_limit_bytes=32 * 1024 * 1024,
        ),
    )(*args)


# ------------------------------ JAX glue ----------------------------------- #

def _im2col_3x3(x_nhwc):
    """3x3, pad=1 im2col (reference only). (B*H*W, 9*Cin), (dy, dx, cin) order."""
    b, h, w, c = x_nhwc.shape
    xp = jnp.pad(x_nhwc, ((0, 0), (1, 1), (1, 1), (0, 0)))
    cols = [xp[:, dy:dy + h, dx:dx + w, :] for dy in range(3) for dx in range(3)]
    return jnp.concatenate(cols, axis=-1).reshape(b * h * w, 9 * c)


def _prepare_padded_params(params):
    """Zero-pad matmul dims to lane multiples, split the conv weight into
    per-tap slabs, cast matmul weights to bf16 (MXU-native), biases stay f32."""
    c1 = params["wb"].shape[1]
    cin = params["wb"].shape[0] // 9
    c2 = params["wh"].shape[1]
    c3 = params["wp"].shape[1]
    k = params["wk"].shape[1]
    cinp = _round_up(cin, 8)
    c1p, c2p, c3p, kp = (_round_up(c, LANE) for c in (c1, c2, c3, k))
    wb = params["wb"].reshape(9, cin, c1)
    wb = jnp.pad(wb, ((0, 0), (0, cinp - cin), (0, c1p - c1))).astype(jnp.bfloat16)
    bb = jnp.pad(params["bb"], ((0, 0), (0, c1p - c1)))
    wh = jnp.pad(params["wh"], ((0, c1p - c1), (0, c2p - c2))).astype(jnp.bfloat16)
    bh = jnp.pad(params["bh"], ((0, 0), (0, c2p - c2)))
    wp = jnp.pad(params["wp"], ((0, c2p - c2), (0, c3p - c3))).astype(jnp.bfloat16)
    bp = jnp.pad(params["bp"], ((0, 0), (0, c3p - c3)))
    wk = jnp.pad(params["wk"], ((0, c3p - c3), (0, kp - k))).astype(jnp.bfloat16)
    return wb, bb, wh, bh, wp, bp, wk


def init_params(key, cin, c1, c2, c3, k):
    ks = jax.random.split(key, 8)
    scale = 0.1
    # Backbone conv weight stored torch-style (Cout, Cin, 3, 3), then packed
    # to (9*Cin, Cout) with (dy, dx, cin) row order to match _im2col_3x3.
    wb_t = scale * jax.random.normal(ks[0], (c1, cin, 3, 3), jnp.float32)
    wb = jnp.transpose(wb_t, (2, 3, 1, 0)).reshape(9 * cin, c1)
    bb = scale * jax.random.normal(ks[1], (1, c1), jnp.float32)
    wh = scale * jax.random.normal(ks[2], (c1, c2), jnp.float32)
    bh = scale * jax.random.normal(ks[3], (1, c2), jnp.float32)
    wp = scale * jax.random.normal(ks[4], (c2, c3), jnp.float32)
    bp = scale * jax.random.normal(ks[5], (1, c3), jnp.float32)
    wk = scale * jax.random.normal(ks[6], (c3, k), jnp.float32)
    return dict(wb=wb, bb=bb, wh=wh, bh=bh, wp=wp, bp=bp, wk=wk)


@functools.partial(jax.jit, static_argnames=("predict", "tile_h", "channels_last"))
def swav_forward(x_nchw, params, predict=False, tile_h=8, channels_last=False):
    """x_nchw: (B, Cin, H, W) f32.  Returns PyTorch-style NCHW f32 outputs
    (set channels_last=True to skip the final transposes if the consumer
    accepts NHWC).  tile_h is the h-rows-per-grid-step knob: keep the grid
    at >=4-8 steps per TensorCore while tiles stay large."""
    b, cin, h, w = x_nchw.shape
    assert tile_h >= 8 and tile_h % 8 == 0
    he = _round_up(h, tile_h)               # row-pad so any H works (cdiv grid)
    hp = he + tile_h                        # +1 top zero row, zeros below for halo
    cinp = _round_up(cin, 8)

    # NHWC channels-last, spatially zero-padded for the 3x3 conv (pad=1), plus
    # extra zero rows at the bottom so the halo BlockSpec never reads OOB.
    x_nhwc = jnp.transpose(x_nchw, (0, 2, 3, 1)).astype(jnp.bfloat16)
    xpad = jnp.pad(x_nhwc, ((0, 0), (1, hp - h - 1), (1, 1), (0, cinp - cin)))

    padded = _prepare_padded_params(params)
    c2 = params["wh"].shape[1]
    c3 = params["wp"].shape[1]
    k = params["wk"].shape[1]

    slab = _swav_pallas(xpad, *padded, predict=predict, tile_h=tile_h,
                        batch=b, he=he, width=w, c2=c2, c3=c3, k=k)
    slab = slab.reshape(b, he, w, -1)[:, :h]        # (B, H, W, SLAB) bf16

    def pick(lo, hi):
        out = slab[..., lo:hi].astype(jnp.float32)
        return out if channels_last else jnp.transpose(out, (0, 3, 1, 2))

    rep = pick(0, c2)
    proj = pick(c2, c2 + c3)
    if predict:
        sim = pick(c2 + c3, c2 + c3 + k)
        return rep, proj, sim
    return rep, proj


# ------------------------------ reference ---------------------------------- #

def swav_reference(x_nchw, params, predict=False):
    """Pure-JAX reference mirroring the module semantics and the bf16-operand
    / f32-accumulate numerics policy of the kernel (unpadded weights)."""
    b, cin, h, w = x_nchw.shape
    f32, bf16 = jnp.float32, jnp.bfloat16
    x_nhwc = jnp.transpose(x_nchw, (0, 2, 3, 1)).astype(bf16)
    patches = _im2col_3x3(x_nhwc)
    feat = jnp.dot(patches, params["wb"].astype(bf16), preferred_element_type=f32)
    feat = jnp.maximum(feat + params["bb"], 0.0)
    rep = jnp.dot(feat.astype(bf16), params["wh"].astype(bf16),
                  preferred_element_type=f32)
    rep = jnp.maximum(rep + params["bh"], 0.0)
    proj = jnp.dot(rep.astype(bf16), params["wp"].astype(bf16),
                   preferred_element_type=f32) + params["bp"]

    def to_nchw(rows):
        return jnp.transpose(rows.reshape(b, h, w, -1), (0, 3, 1, 2))

    if predict:
        sumsq = jnp.sum(proj * proj, axis=-1, keepdims=True)
        proj = proj * jax.lax.rsqrt(jnp.maximum(sumsq, 1e-24))
        sim = jnp.dot(proj.astype(bf16), params["wk"].astype(bf16),
                      preferred_element_type=f32)
        return to_nchw(rep), to_nchw(proj), to_nchw(sim)
    return to_nchw(rep), to_nchw(proj)


# -------------------------------- main ------------------------------------- #

if __name__ == "__main__":
    B, CIN, H, W = 2, 4, 16, 16          # grid = (B=2, H/tile_h=2) -> 4 steps
    C1, C2, C3, K = 32, 32, 16, 8        # backbone / head / projector / protos

    key = jax.random.PRNGKey(0)
    kx, kprm = jax.random.split(key)
    x = jax.random.normal(kx, (B, CIN, H, W), jnp.float32)
    params = init_params(kprm, CIN, C1, C2, C3, K)

    # predict=False path: (representation, projection) — no prototypes matmul.
    rep, proj = swav_forward(x, params, predict=False)
    jax.block_until_ready((rep, proj))

    # predict=True path: (representation, normalized projection, similarity).
    rep_p, proj_p, sim_p = swav_forward(x, params, predict=True)
    jax.block_until_ready((rep_p, proj_p, sim_p))

    # correctness checks vs pure-JAX reference (bf16 output rounding allowed).
    rep_r, proj_r = swav_reference(x, params, predict=False)
    rep_pr, proj_pr, sim_pr = swav_reference(x, params, predict=True)
    tol = dict(atol=1e-2, rtol=1e-2)
    assert jnp.allclose(rep, rep_r, **tol)
    assert jnp.allclose(proj, proj_r, **tol)
    assert jnp.allclose(rep_p, rep_pr, **tol)
    assert jnp.allclose(proj_p, proj_pr, **tol)
    assert jnp.allclose(sim_p, sim_pr, **tol)
    assert rep.shape == (B, C2, H, W)
    assert proj.shape == (B, C3, H, W)
    assert sim_p.shape == (B, K, H, W)

    print("KERNEL_OK")
</pallas_src>

<mosaic_0001>
module attributes {stable_mosaic.version = 11 : i64} {
  func.func @_swav_kernel(%arg0: i32, %arg1: i32, %arg2: memref<1x8x18x8xbf16, #tpu.memory_space<vmem>>, %arg3: memref<1x2x18x8xbf16, #tpu.memory_space<vmem>>, %arg4: memref<9x8x128xbf16, #tpu.memory_space<vmem>>, %arg5: memref<1x128xf32, #tpu.memory_space<vmem>>, %arg6: memref<128x128xbf16, #tpu.memory_space<vmem>>, %arg7: memref<1x128xf32, #tpu.memory_space<vmem>>, %arg8: memref<128x128xbf16, #tpu.memory_space<vmem>>, %arg9: memref<1x128xf32, #tpu.memory_space<vmem>>, %arg10: memref<128x128xbf16, #tpu.memory_space<vmem>>) attributes {dimension_semantics = [#tpu.dimension_semantics<parallel>, #tpu.dimension_semantics<parallel>], iteration_bounds = array<i64: 2, 2>, scalar_prefetch = 0 : i64, scratch_operands = 0 : i64, tpu.core_type = #tpu.core_type<tc>, window_params = [{transform_indices = @transform_0, window_bounds = array<i64: 1, 8, 18, 8>}, {transform_indices = @transform_1, window_bounds = array<i64: 1, 2, 18, 8>}, {pipeline_mode = #tpu.pipeline_mode<synchronous>, transform_indices = @transform_2, window_bounds = array<i64: 9, 8, 128>}, {pipeline_mode = #tpu.pipeline_mode<synchronous>, transform_indices = @transform_3, window_bounds = array<i64: 1, 128>}, {pipeline_mode = #tpu.pipeline_mode<synchronous>, transform_indices = @transform_4, window_bounds = array<i64: 128, 128>}, {pipeline_mode = #tpu.pipeline_mode<synchronous>, transform_indices = @transform_5, window_bounds = array<i64: 1, 128>}, {pipeline_mode = #tpu.pipeline_mode<synchronous>, transform_indices = @transform_6, window_bounds = array<i64: 128, 128>}, {pipeline_mode = #tpu.pipeline_mode<synchronous>, transform_indices = @transform_7, window_bounds = array<i64: 1, 128>}, {transform_indices = @transform_8, window_bounds = array<i64: 128, 128>}]} {
    %c0 = arith.constant 0 : index
    %c0_0 = arith.constant 0 : index
    %c0_1 = arith.constant 0 : index
    %c0_2 = arith.constant 0 : index
    %0 = vector.load %arg2[%c0, %c0_0, %c0_1, %c0_2] : memref<1x8x18x8xbf16, #tpu.memory_space<vmem>>, vector<1x8x18x8xbf16>
    %1 = vector.shape_cast %0 : vector<1x8x18x8xbf16> to vector<8x18x8xbf16>
    %c0_3 = arith.constant 0 : index
    %c0_4 = arith.constant 0 : index
    %c0_5 = arith.constant 0 : index
    %c0_6 = arith.constant 0 : index
    %2 = vector.load %arg3[%c0_3, %c0_4, %c0_5, %c0_6] : memref<1x2x18x8xbf16, #tpu.memory_space<vmem>>, vector<1x2x18x8xbf16>
    %3 = vector.shape_cast %2 : vector<1x2x18x8xbf16> to vector<2x18x8xbf16>
    %4 = tpu.concatenate %1, %3 in 0 : vector<8x18x8xbf16>, vector<2x18x8xbf16> -> vector<10x18x8xbf16>
    %5 = vector.extract_strided_slice %4 {offsets = [0, 0, 0], sizes = [8, 16, 8], strides = [1, 1, 1]} : vector<10x18x8xbf16> to vector<8x16x8xbf16>
    %6 = vector.shape_cast %5 : vector<8x16x8xbf16> to vector<128x8xbf16>
    %c0_7 = arith.constant 0 : index
    %c0_8 = arith.constant 0 : index
    %c0_9 = arith.constant 0 : index
    %7 = vector.load %arg4[%c0_7, %c0_8, %c0_9] : memref<9x8x128xbf16, #tpu.memory_space<vmem>>, vector<1x8x128xbf16>
    %8 = vector.shape_cast %7 : vector<1x8x128xbf16> to vector<8x128xbf16>
    %cst = arith.constant dense<0.000000e+00> : vector<128x128xf32>
    %9 = tpu.matmul %6, %8, %cst {dimension_numbers = #tpu.dot_dimension_numbers<[1], [0], [0], [1], [0, 0, 1, 1], [], []>} : vector<128x8xbf16>, vector<8x128xbf16>, vector<128x128xf32> -> vector<128x128xf32>
    %10 = vector.extract_strided_slice %4 {offsets = [0, 1, 0], sizes = [8, 16, 8], strides = [1, 1, 1]} : vector<10x18x8xbf16> to vector<8x16x8xbf16>
    %11 = vector.shape_cast %10 : vector<8x16x8xbf16> to vector<128x8xbf16>
    %c1 = arith.constant 1 : index
    %c0_10 = arith.constant 0 : index
    %c0_11 = arith.constant 0 : index
    %12 = vector.load %arg4[%c1, %c0_10, %c0_11] : memref<9x8x128xbf16, #tpu.memory_space<vmem>>, vector<1x8x128xbf16>
    %13 = vector.shape_cast %12 : vector<1x8x128xbf16> to vector<8x128xbf16>
    %cst_12 = arith.constant dense<0.000000e+00> : vector<128x128xf32>
    %14 = tpu.matmul %11, %13, %cst_12 {dimension_numbers = #tpu.dot_dimension_numbers<[1], [0], [0], [1], [0, 0, 1, 1], [], []>} : vector<128x8xbf16>, vector<8x128xbf16>, vector<128x128xf32> -> vector<128x128xf32>
    %15 = arith.addf %9, %14 : vector<128x128xf32>
    %16 = vector.extract_strided_slice %4 {offsets = [0, 2, 0], sizes = [8, 16, 8], strides = [1, 1, 1]} : vector<10x18x8xbf16> to vector<8x16x8xbf16>
    %17 = vector.shape_cast %16 : vector<8x16x8xbf16> to vector<128x8xbf16>
    %c2 = arith.constant 2 : index
    %c0_13 = arith.constant 0 : index
    %c0_14 = arith.constant 0 : index
    %18 = vector.load %arg4[%c2, %c0_13, %c0_14] : memref<9x8x128xbf16, #tpu.memory_space<vmem>>, vector<1x8x128xbf16>
    %19 = vector.shape_cast %18 : vector<1x8x128xbf16> to vector<8x128xbf16>
    %cst_15 = arith.constant dense<0.000000e+00> : vector<128x128xf32>
    %20 = tpu.matmul %17, %19, %cst_15 {dimension_numbers = #tpu.dot_dimension_numbers<[1], [0], [0], [1], [0, 0, 1, 1], [], []>} : vector<128x8xbf16>, vector<8x128xbf16>, vector<128x128xf32> -> vector<128x128xf32>
    %21 = arith.addf %15, %20 : vector<128x128xf32>
    %22 = vector.extract_strided_slice %4 {offsets = [1, 0, 0], sizes = [8, 16, 8], strides = [1, 1, 1]} : vector<10x18x8xbf16> to vector<8x16x8xbf16>
    %23 = vector.shape_cast %22 : vector<8x16x8xbf16> to vector<128x8xbf16>
    %c3 = arith.constant 3 : index
    %c0_16 = arith.constant 0 : index
    %c0_17 = arith.constant 0 : index
    %24 = vector.load %arg4[%c3, %c0_16, %c0_17] : memref<9x8x128xbf16, #tpu.memory_space<vmem>>, vector<1x8x128xbf16>
    %25 = vector.shape_cast %24 : vector<1x8x128xbf16> to vector<8x128xbf16>
    %cst_18 = arith.constant dense<0.000000e+00> : vector<128x128xf32>
    %26 = tpu.matmul %23, %25, %cst_18 {dimension_numbers = #tpu.dot_dimension_numbers<[1], [0], [0], [1], [0, 0, 1, 1], [], []>} : vector<128x8xbf16>, vector<8x128xbf16>, vector<128x128xf32> -> vector<128x128xf32>
    %27 = arith.addf %21, %26 : vector<128x128xf32>
    %28 = vector.extract_strided_slice %4 {offsets = [1, 1, 0], sizes = [8, 16, 8], strides = [1, 1, 1]} : vector<10x18x8xbf16> to vector<8x16x8xbf16>
    %29 = vector.shape_cast %28 : vector<8x16x8xbf16> to vector<128x8xbf16>
    %c4 = arith.constant 4 : index
    %c0_19 = arith.constant 0 : index
    %c0_20 = arith.constant 0 : index
    %30 = vector.load %arg4[%c4, %c0_19, %c0_20] : memref<9x8x128xbf16, #tpu.memory_space<vmem>>, vector<1x8x128xbf16>
    %31 = vector.shape_cast %30 : vector<1x8x128xbf16> to vector<8x128xbf16>
    %cst_21 = arith.constant dense<0.000000e+00> : vector<128x128xf32>
    %32 = tpu.matmul %29, %31, %cst_21 {dimension_numbers = #tpu.dot_dimension_numbers<[1], [0], [0], [1], [0, 0, 1, 1], [], []>} : vector<128x8xbf16>, vector<8x128xbf16>, vector<128x128xf32> -> vector<128x128xf32>
    %33 = arith.addf %27, %32 : vector<128x128xf32>
    %34 = vector.extract_strided_slice %4 {offsets = [1, 2, 0], sizes = [8, 16, 8], strides = [1, 1, 1]} : vector<10x18x8xbf16> to vector<8x16x8xbf16>
    %35 = vector.shape_cast %34 : vector<8x16x8xbf16> to vector<128x8xbf16>
    %c5 = arith.constant 5 : index
    %c0_22 = arith.constant 0 : index
    %c0_23 = arith.constant 0 : index
    %36 = vector.load %arg4[%c5, %c0_22, %c0_23] : memref<9x8x128xbf16, #tpu.memory_space<vmem>>, vector<1x8x128xbf16>
    %37 = vector.shape_cast %36 : vector<1x8x128xbf16> to vector<8x128xbf16>
    %cst_24 = arith.constant dense<0.000000e+00> : vector<128x128xf32>
    %38 = tpu.matmul %35, %37, %cst_24 {dimension_numbers = #tpu.dot_dimension_numbers<[1], [0], [0], [1], [0, 0, 1, 1], [], []>} : vector<128x8xbf16>, vector<8x128xbf16>, vector<128x128xf32> -> vector<128x128xf32>
    %39 = arith.addf %33, %38 : vector<128x128xf32>
    %40 = vector.extract_strided_slice %4 {offsets = [2, 0, 0], sizes = [8, 16, 8], strides = [1, 1, 1]} : vector<10x18x8xbf16> to vector<8x16x8xbf16>
    %41 = vector.shape_cast %40 : vector<8x16x8xbf16> to vector<128x8xbf16>
    %c6 = arith.constant 6 : index
    %c0_25 = arith.constant 0 : index
    %c0_26 = arith.constant 0 : index
    %42 = vector.load %arg4[%c6, %c0_25, %c0_26] : memref<9x8x128xbf16, #tpu.memory_space<vmem>>, vector<1x8x128xbf16>
    %43 = vector.shape_cast %42 : vector<1x8x128xbf16> to vector<8x128xbf16>
    %cst_27 = arith.constant dense<0.000000e+00> : vector<128x128xf32>
    %44 = tpu.matmul %41, %43, %cst_27 {dimension_numbers = #tpu.dot_dimension_numbers<[1], [0], [0], [1], [0, 0, 1, 1], [], []>} : vector<128x8xbf16>, vector<8x128xbf16>, vector<128x128xf32> -> vector<128x128xf32>
    %45 = arith.addf %39, %44 : vector<128x128xf32>
    %46 = vector.extract_strided_slice %4 {offsets = [2, 1, 0], sizes = [8, 16, 8], strides = [1, 1, 1]} : vector<10x18x8xbf16> to vector<8x16x8xbf16>
    %47 = vector.shape_cast %46 : vector<8x16x8xbf16> to vector<128x8xbf16>
    %c7 = arith.constant 7 : index
    %c0_28 = arith.constant 0 : index
    %c0_29 = arith.constant 0 : index
    %48 = vector.load %arg4[%c7, %c0_28, %c0_29] : memref<9x8x128xbf16, #tpu.memory_space<vmem>>, vector<1x8x128xbf16>
    %49 = vector.shape_cast %48 : vector<1x8x128xbf16> to vector<8x128xbf16>
    %cst_30 = arith.constant dense<0.000000e+00> : vector<128x128xf32>
    %50 = tpu.matmul %47, %49, %cst_30 {dimension_numbers = #tpu.dot_dimension_numbers<[1], [0], [0], [1], [0, 0, 1, 1], [], []>} : vector<128x8xbf16>, vector<8x128xbf16>, vector<128x128xf32> -> vector<128x128xf32>
    %51 = arith.addf %45, %50 : vector<128x128xf32>
    %52 = vector.extract_strided_slice %4 {offsets = [2, 2, 0], sizes = [8, 16, 8], strides = [1, 1, 1]} : vector<10x18x8xbf16> to vector<8x16x8xbf16>
    %53 = vector.shape_cast %52 : vector<8x16x8xbf16> to vector<128x8xbf16>
    %c8 = arith.constant 8 : index
    %c0_31 = arith.constant 0 : index
    %c0_32 = arith.constant 0 : index
    %54 = vector.load %arg4[%c8, %c0_31, %c0_32] : memref<9x8x128xbf16, #tpu.memory_space<vmem>>, vector<1x8x128xbf16>
    %55 = vector.shape_cast %54 : vector<1x8x128xbf16> to vector<8x128xbf16>
    %cst_33 = arith.constant dense<0.000000e+00> : vector<128x128xf32>
    %56 = tpu.matmul %53, %55, %cst_33 {dimension_numbers = #tpu.dot_dimension_numbers<[1], [0], [0], [1], [0, 0, 1, 1], [], []>} : vector<128x8xbf16>, vector<8x128xbf16>, vector<128x128xf32> -> vector<128x128xf32>
    %57 = arith.addf %51, %56 : vector<128x128xf32>
    %c0_34 = arith.constant 0 : index
    %c0_35 = arith.constant 0 : index
    %58 = vector.load %arg5[%c0_34, %c0_35] : memref<1x128xf32, #tpu.memory_space<vmem>>, vector<1x128xf32>
    %59 = vector.broadcast %58 : vector<1x128xf32> to vector<128x128xf32>
    %60 = arith.addf %57, %59 : vector<128x128xf32>
    %cst_36 = arith.constant 0.000000e+00 : f32
    %61 = vector.broadcast %cst_36 : f32 to vector<128x128xf32>
    %62 = arith.maximumf %60, %61 : vector<128x128xf32>
    %63 = arith.truncf %62 : vector<128x128xf32> to vector<128x128xbf16>
    %c0_37 = arith.constant 0 : index
    %c0_38 = arith.constant 0 : index
    %64 = vector.load %arg6[%c0_37, %c0_38] : memref<128x128xbf16, #tpu.memory_space<vmem>>, vector<128x128xbf16>
    %cst_39 = arith.constant dense<0.000000e+00> : vector<128x128xf32>
    %65 = tpu.matmul %63, %64, %cst_39 {dimension_numbers = #tpu.dot_dimension_numbers<[1], [0], [0], [1], [0, 0, 1, 1], [], []>} : vector<128x128xbf16>, vector<128x128xbf16>, vector<128x128xf32> -> vector<128x128xf32>
    %c0_40 = arith.constant 0 : index
    %c0_41 = arith.constant 0 : index
    %66 = vector.load %arg7[%c0_40, %c0_41] : memref<1x128xf32, #tpu.memory_space<vmem>>, vector<1x128xf32>
    %67 = vector.broadcast %66 : vector<1x128xf32> to vector<128x128xf32>
    %68 = arith.addf %65, %67 : vector<128x128xf32>
    %cst_42 = arith.constant 0.000000e+00 : f32
    %69 = vector.broadcast %cst_42 : f32 to vector<128x128xf32>
    %70 = arith.maximumf %68, %69 : vector<128x128xf32>
    %71 = arith.truncf %70 : vector<128x128xf32> to vector<128x128xbf16>
    %c0_43 = arith.constant 0 : index
    %c0_44 = arith.constant 0 : index
    %72 = vector.load %arg8[%c0_43, %c0_44] : memref<128x128xbf16, #tpu.memory_space<vmem>>, vector<128x128xbf16>
    %cst_45 = arith.constant dense<0.000000e+00> : vector<128x128xf32>
    %73 = tpu.matmul %71, %72, %cst_45 {dimension_numbers = #tpu.dot_dimension_numbers<[1], [0], [0], [1], [0, 0, 1, 1], [], []>} : vector<128x128xbf16>, vector<128x128xbf16>, vector<128x128xf32> -> vector<128x128xf32>
    %c0_46 = arith.constant 0 : index
    %c0_47 = arith.constant 0 : index
    %74 = vector.load %arg9[%c0_46, %c0_47] : memref<1x128xf32, #tpu.memory_space<vmem>>, vector<1x128xf32>
    %75 = vector.broadcast %74 : vector<1x128xf32> to vector<128x128xf32>
    %76 = arith.addf %73, %75 : vector<128x128xf32>
    %cst_48 = arith.constant 0.000000e+00 : bf16
    %77 = vector.broadcast %cst_48 : bf16 to vector<128x128xbf16>
    %c0_49 = arith.constant 0 : index
    %c0_50 = arith.constant 0 : index
    %78 = vector.load %arg10[%c0_49, %c0_50] : memref<128x128xbf16, #tpu.memory_space<vmem>>, vector<128x128xbf16>
    tpu.vector_store %arg10[%c0_49, %c0_50], %77 {strides = array<i32>} : memref<128x128xbf16, #tpu.memory_space<vmem>>, vector<128x128xbf16>,
    %79 = vector.extract_strided_slice %70 {offsets = [0, 0], sizes = [128, 32], strides = [1, 1]} : vector<128x128xf32> to vector<128x32xf32>
    %80 = arith.truncf %79 : vector<128x32xf32> to vector<128x32xbf16>
    %c0_51 = arith.constant 0 : index
    %c0_52 = arith.constant 0 : index
    %81 = vector.load %arg10[%c0_51, %c0_52] : memref<128x128xbf16, #tpu.memory_space<vmem>>, vector<128x32xbf16>
    tpu.vector_store %arg10[%c0_51, %c0_52], %80 {strides = array<i32>} : memref<128x128xbf16, #tpu.memory_space<vmem>>, vector<128x32xbf16>,
    %82 = vector.extract_strided_slice %76 {offsets = [0, 0], sizes = [128, 16], strides = [1, 1]} : vector<128x128xf32> to vector<128x16xf32>
    %83 = arith.truncf %82 : vector<128x16xf32> to vector<128x16xbf16>
    %c0_53 = arith.constant 0 : index
    %c32 = arith.constant 32 : index
    %84 = vector.load %arg10[%c0_53, %c32] : memref<128x128xbf16, #tpu.memory_space<vmem>>, vector<128x16xbf16>
    tpu.vector_store %arg10[%c0_53, %c32], %83 {strides = array<i32>} : memref<128x128xbf16, #tpu.memory_space<vmem>>, vector<128x16xbf16>,
    return
  }
  func.func @transform_0(%arg0: i32, %arg1: i32) -> (i32, i32, i32, i32) {
    %c0_i32 = arith.constant 0 : i32
    %c0_i32_0 = arith.constant 0 : i32
    %c0_i32_1 = arith.constant 0 : i32
    return %arg0, %arg1, %c0_i32, %c0_i32_0 : i32, i32, i32, i32
  }
  func.func @transform_1(%arg0: i32, %arg1: i32) -> (i32, i32, i32, i32) {
    %c1_i32 = arith.constant 1 : i32
    %0 = arith.addi %arg1, %c1_i32 : i32
    %c4_i32 = arith.constant 4 : i32
    %1 = arith.muli %0, %c4_i32 : i32
    %c0_i32 = arith.constant 0 : i32
    %c0_i32_0 = arith.constant 0 : i32
    %c0_i32_1 = arith.constant 0 : i32
    return %arg0, %1, %c0_i32, %c0_i32_0 : i32, i32, i32, i32
  }
  func.func @transform_2(%arg0: i32, %arg1: i32) -> (i32, i32, i32) {
    %c0_i32 = arith.constant 0 : i32
    %c0_i32_0 = arith.constant 0 : i32
    %c0_i32_1 = arith.constant 0 : i32
    %c0_i32_2 = arith.constant 0 : i32
    return %c0_i32, %c0_i32_0, %c0_i32_1 : i32, i32, i32
  }
  func.func @transform_3(%arg0: i32, %arg1: i32) -> (i32, i32) {
    %c0_i32 = arith.constant 0 : i32
    %c0_i32_0 = arith.constant 0 : i32
    %c0_i32_1 = arith.constant 0 : i32
    return %c0_i32, %c0_i32_0 : i32, i32
  }
  func.func @transform_4(%arg0: i32, %arg1: i32) -> (i32, i32) {
    %c0_i32 = arith.constant 0 : i32
    %c0_i32_0 = arith.constant 0 : i32
    %c0_i32_1 = arith.constant 0 : i32
    return %c0_i32, %c0_i32_0 : i32, i32
  }
  func.func @transform_5(%arg0: i32, %arg1: i32) -> (i32, i32) {
    %c0_i32 = arith.constant 0 : i32
    %c0_i32_0 = arith.constant 0 : i32
    %c0_i32_1 = arith.constant 0 : i32
    return %c0_i32, %c0_i32_0 : i32, i32
  }
  func.func @transform_6(%arg0: i32, %arg1: i32) -> (i32, i32) {
    %c0_i32 = arith.constant 0 : i32
    %c0_i32_0 = arith.constant 0 : i32
    %c0_i32_1 = arith.constant 0 : i32
    return %c0_i32, %c0_i32_0 : i32, i32
  }
  func.func @transform_7(%arg0: i32, %arg1: i32) -> (i32, i32) {
    %c0_i32 = arith.constant 0 : i32
    %c0_i32_0 = arith.constant 0 : i32
    %c0_i32_1 = arith.constant 0 : i32
    return %c0_i32, %c0_i32_0 : i32, i32
  }
  func.func @transform_8(%arg0: i32, %arg1: i32) -> (i32, i32) {
    %c2_i32 = arith.constant 2 : i32
    %0 = arith.muli %arg0, %c2_i32 : i32
    %1 = arith.addi %0, %arg1 : i32
    %c0_i32 = arith.constant 0 : i32
    %c0_i32_0 = arith.constant 0 : i32
    return %1, %c0_i32 : i32, i32
  }
}

</mosaic_0001>

<bundles_post_ra>
// kernel: swav_forward.1
= control target key start
LH: loop header
LB: loop body
LE: loop exit
PB: predicated region body
PF: predicated region fallthrough
CT: control target
= control target key end

     0   :  { %s2495_s27 = smov 0   ;;  %s2497_s28 = smov 0   ;;  %s3283_s0 = inlined_call_operand.vmem [shape: bf16[2,24,18,8], index: 0, kind: input, shape index: {}, may-alias: {0,1}]   ;;  %s3284_s1 = inlined_call_operand.vmem [shape: bf16[2,24,18,8], index: 1, kind: input, shape index: {}, may-alias: {0,1}]   ;;  %s3285_s2 = inlined_call_operand.vmem [shape: bf16[9,8,128], index: 2, kind: input, shape index: {}]   ;;  %s3286_s3 = inlined_call_operand.vmem [shape: f32[1,128], index: 3, kind: input, shape index: {}]   ;;  %s3287_s4 = inlined_call_operand.vmem [shape: bf16[128,128], index: 4, kind: input, shape index: {}]   ;;  %s3288_s5 = inlined_call_operand.vmem [shape: f32[1,128], index: 5, kind: input, shape index: {}]   ;;  %s3289_s6 = inlined_call_operand.vmem [shape: bf16[128,128], index: 6, kind: input, shape index: {}]   ;;  %s3290_s7 = inlined_call_operand.vmem [shape: f32[1,128], index: 7, kind: input, shape index: {}]   ;;  %s3291_s8 = inlined_call_operand.vmem [shape: bf16[512,128], index: 8, kind: output, shape index: {}]  }
   0x1   :  { %s2499_s29 = smov 0   ;;  %s2501_s30 = smov 0  }
   0x2   :  { %s2503_s9 = smov 0  }
   0x3 LB: > { %s27_s10 = sadd.s32 1, %s2438_s29  ;;  %s30_s11 = sadd.s32 1, %s2442_s30  ;;  %s2446_s9 = sphi %s2503_s9, %s18_s9   ;;  %s2442_s30 = sphi %s2501_s30, %s3299_s30   ;;  %s2438_s29 = sphi %s2499_s29, %s3298_s29   ;;  %s2434_s28 = sphi %s2497_s28, %s3297_s28   ;;  %s2430_s27 = sphi %s2495_s27, %s3296_s27  }
   0x4   : > { %p28_p0 = scmp.ge.s32.totalorder %s27_s10, 2  ;;  %p2117_p1 = scmp.ge.s32.totalorder %s2446_s9, 1 }
   0x5   : > { %p312_p2 = scmp.lt.s32.totalorder %s2446_s9, 5 }
   0x6   : > { %s3301_s10 = smov (%p28_p0, %s27_s10), 0  ;;  %s3303_s11 = smov (!%p28_p0, %s30_s11), %s2442_s30 }
   0x7   : > { %p313_p3 = pnand %p2117_p1, %p312_p2  ;;  %p32_p4 = scmp.ge.s32.totalorder %s3303_s11, 2 }
   0x8   : > { %s2533_s14 = sshll.u32 (!%p313_p3), %s2430_s27, 3  ;;  %p366_p5 = scmp.lt.s32.totalorder (!%p313_p3), %s2434_s28, 1 }
   0x9   : > { %s3305_s11 = smov (%p32_p4, %s3303_s11), 0  ;;  %316 = sbr.rel (%p313_p3) target bundleno = 928 (0x3a0), region = 52 }
   0xa   : > { %p368_p6 = scmp.lt.s32.totalorder (!%p313_p3), %s2533_s14, 23  ;;  %s2356_s13 = sadd.s32 (!%p313_p3), 8, %s2533_s14 }
   0xb   : > { %p381_p7 = scmp.lt.s32.totalorder (!%p313_p3), %s2356_s13, 23  ;;  %s2123_s21 = sshll.u32 (!%p313_p3), %s2434_s28, 1 }
   0xc   : > { %s392_s22 = sadd.s32 (!%p313_p3), %s2430_s27, %s2123_s21  ;;  %s2449_s19 = smov (!%p313_p3), 32  }
   0xe   : > { %vm679_vm0 = vcmask 1043456   ;;  %v2183_v0 = vld [vmem:[%s3285_s2 + $0x8] sm:$0xf]  ;;  %v2126_v2 = vld [vmem:[%s3285_s2 + $0x4] sm:$0xf]  ;;  %s2545_s17 = scalar_select %p366_p5, %s2434_s28, 1 }
   0xf   : > { %v2537_v1 = vsel %vm679_vm0, %v2183_v0, 0  ;;  %v681_v3 = vsel %vm679_vm0, %v2126_v2, 0  ;;  %v432_v4 = vld [vmem:[%s3285_s2] sm:$0xf]  ;;  %s369_s20 = scalar_select %p368_p6, %s2533_s14, 23  ;;  %vm856_vm1 = vcmask 1042432  }
  0x10   : > { %975 = vmatpush.bf16.msra.mxu2 %v2537_v1  ;;  %690 = vmatpush.bf16.msra.mxu0 %v681_v3  ;;  %v797_v5 = vsel %vm679_vm0, %v432_v4, 0  ;;  %v2205_v6 = vld [vmem:[%s3285_s2 + $0x10] sm:$0xf]  ;;  %s2361_s23 = smul.u32 72, %s2545_s17  ;;  %vm857_vm2 = vcmask 1046532   ;;  %vm654_vm3 = vcmask 64512  }
  0x11   : > { %2357 = vmatpush.bf16.msra.mxu3 %v681_v3  ;;  %806 = vmatpush.bf16.msra.mxu1 %v797_v5  ;;  %v1144_v7 = vsel %vm679_vm0, %v2205_v6, 0  ;;  %s2360_s24 = smul.u32 3, %s369_s20  ;;  %vm2565_vm4 = vmor %vm856_vm1, %vm857_vm2  ;;  %vm433_vm5 = vsmask.f32 3328  ;;  %vm434_vm6 = vsmask.f32 7440 }
  0x12   : > { %vm2592_vm7 = vmor %vm433_vm5, %vm434_vm6  ;;  %s3307_s13 = smov (!%p381_p7, %s2356_s13), 23  ;;  %vm1891_vm8 = vcmask 257024   ;;  %vm1988_vm9 = vcmask 388352  }
  0x13   : > { %s372_s25 = sadd.s32 %s2361_s23, %s2360_s24 }
  0x14   : > { %1153 = vmatpush.bf16.msrb.mxu0 %v1144_v7  ;;  %s2119_s26 = sshll.u32 %s372_s25, 2 }
  0x15   : > { %2358 = vmatpush.bf16.msrb.mxu3 %v797_v5  ;;  %s2563_s15 = scalar_lea.vmem %s3283_s0, %s2119_s26  ;;  %s2124_s26 = sshll.u32 %s392_s22, 4 }
  0x16   : > { %v402_v9 = vld [vmem:[%s2563_s15] sm:$0xf]  ;;  %v403_v10 = vld [vmem:[%s2563_s15 + $0x4] sm:$0xf]  ;;  %v404_v11 = vld [vmem:[%s2563_s15 + $0x8] sm:$0x1] }
  0x17   : > { %v2175_v12 = vrot.slane %v402_v9, 9  ;;  %v861_v13 = vrot.slane %v403_v10, 5  ;;  %v864_v14 = vrot.slane %v404_v11, 5  ;;  %v437_v15 = vshrl.u32 %v402_v9, 16  ;;  %v2573_v16 = vld [vmem:[%s2563_s15 + $0x48] sm:$0xf] }
  0x18   : > { %v440_v17 = vshll.u32 %v402_v9, 16  ;;  %v446_v18 = vshll.u32 %v403_v10, 16  ;;  %v450_v19 = vshrl.u32 %v403_v10, 16  ;;  %v456_v20 = vshll.u32 %v404_v11, 16  ;;  %v2578_v24 = vld [vmem:[%s2563_s15 + $0x4c] sm:$0xf] }
  0x19   : > { %v862_v21 = vsel %vm2565_vm4, %v2175_v12, %v861_v13  ;;  %v863_v22 = vrot.slane %v861_v13, 4  ;;  %v439_v23 = vrot.slane %v437_v15, 4  ;;  %v581_v25 = vshrl.u32 %v2573_v16, 16  ;;  %v2329_v26 = vld [vmem:[%s2563_s15] sm:$0xff]  ;;  %v2583_v31 = vld [vmem:[%s2563_s15 + $0x50] sm:$0x1] }
  0x1a   : > { %v917_v27 = vunpack.c.l.b16 %v862_v21  ;;  %v442_v28 = vrot.slane %v440_v17, 5  ;;  %v448_v29 = vrot.slane %v446_v18, 5  ;;  %v452_v30 = vrot.slane %v450_v19, 4  ;;  %2167 = vmatmul.msk.bf16.vlgmr.msra.gmra.mxu1 %vm654_vm3, %v2329_v26  ;;  %v405_v48 = vld [vmem:[%s2563_s15 + $0xc] sm:$0xf]  ;;  %p394_p8 = scmp.lt.s32.totalorder %s2124_s26, 63 }
  0x1b   : > { %v865_v32 = vsel %vm2565_vm4, %v863_v22, %v864_v14  ;;  %v458_v33 = vrot.slane %v456_v20, 5  ;;  %v583_v34 = vrot.slane %v581_v25, 4  ;;  %v584_v35 = vshll.u32 %v2573_v16, 16  ;;  %v406_v51 = vld [vmem:[%s2563_s15 + $0x10] sm:$0xf] }
  0x1c   : > { %v918_v36 = vunpack.c.l.b16 %v865_v32  ;;  %v443_v37 = vor.u32 %v442_v28, %v439_v23  ;;  %v453_v38 = vor.u32 %v452_v30, %v448_v29  ;;  %v590_v39 = vshll.u32 %v2578_v24, 16  ;;  %v407_v52 = vld [vmem:[%s2563_s15 + $0x14] sm:$0x1]  ;;  %v2619_v20 = vld [vmem:[%s2563_s15 + $0x58] sm:$0xf]  ;;  %s3309_s26 = smov (!%p394_p8, %s2124_s26), 63 }
  0x1d   : > { %v586_v41 = vrot.slane %v584_v35, 5  ;;  %v594_v42 = vshrl.u32 %v2578_v24, 16  ;;  %v600_v43 = vshll.u32 %v2583_v31, 16  ;;  %v2176_v56 = vrot.slane %v405_v48, 9  ;;  %v2611_v10 = vld [vmem:[%s2563_s15 + $0x54] sm:$0xf] }
  0x1e   : > { %v933_v44 = vpack.c.b16 %v918_v36, %v917_v27  ;;  %v444_v45 = vrot.slane %v443_v37, 4  ;;  %v454_v46 = vrot.slane %v453_v38, 4  ;;  %v592_v47 = vrot.slane %v590_v39, 5  ;;  %v2622_v25 = vld [vmem:[%s2563_s15 + $0x5c] sm:$0x1]  ;;  %v2626_v27 = vld [vmem:[%s2563_s15 + $0xc] sm:$0xff] }
  0x1f   : > { %v587_v49 = vor.u32 %v586_v41, %v583_v34  ;;  %v596_v50 = vrot.slane %v594_v42, 4  ;;  %v602_v55 = vrot.slane %v600_v43, 5  ;;  %v868_v61 = vrot.slane %v406_v51, 5  ;;  %v409_v36 = vld [vmem:[%s2563_s15 + $0x1c] sm:$0xf]  ;;  %s2125_s27 = sshll.u32 %s3309_s26, 2 }
  0x20   : > { %2184 = vmatmul.msk.bf16.vlgmr.msra.gmra.mxu2 %vm654_vm3, %v933_v44  ;;  %v449_v53 = vsel %vm2592_vm7, %v444_v45, %v448_v29  ;;  %v459_v54 = vsel %vm2592_vm7, %v454_v46, %v458_v33  ;;  %v871_v62 = vrot.slane %v407_v52, 5  ;;  %v461_v63 = vshrl.u32 %v405_v48, 16 }
  0x21   : > { %v630_v57 = vunpack.c.l.b16 %v449_v53  ;;  %v631_v58 = vunpack.c.l.b16 %v459_v54  ;;  %v588_v59 = vrot.slane %v587_v49, 4  ;;  %v597_v60 = vor.u32 %v596_v50, %v592_v47 }
  0x22   : > { %v464_v4 = vshll.u32 %v405_v48, 16  ;;  %v869_v6 = vsel %vm2565_vm4, %v2176_v56, %v868_v61  ;;  %v870_v7 = vrot.slane %v868_v61, 4  ;;  %v463_v9 = vrot.slane %v461_v63, 4  ;;  %v408_v48 = vld [vmem:[%s2563_s15 + $0x18] sm:$0xf] }
  0x23   : > { %v646_v0 = vpack.c.b16 %v631_v58, %v630_v57  ;;  %v593_v2 = vsel %vm2592_vm7, %v588_v59, %v592_v47  ;;  %v598_v3 = vrot.slane %v597_v60, 4  ;;  %v919_v12 = vunpack.c.l.b16 %v869_v6 }
  0x24   : > { %v642_v5 = vunpack.c.l.b16 %v593_v2  ;;  %v466_v13 = vrot.slane %v464_v4, 5  ;;  %v470_v14 = vshll.u32 %v406_v51, 16  ;;  %v872_v17 = vsel %vm2565_vm4, %v870_v7, %v871_v62 }
  0x25   : > { %2127 = vmatmul.msk.bf16.vlgmr.msra.gmra.mxu0 %vm654_vm3, %v646_v0  ;;  %v603_v11 = vsel %vm2592_vm7, %v598_v3, %v602_v55  ;;  %v474_v18 = vshrl.u32 %v406_v51, 16  ;;  %v480_v19 = vshll.u32 %v407_v52, 16  ;;  %v920_v21 = vunpack.c.l.b16 %v872_v17  ;;  %v410_v55 = vld [vmem:[%s2563_s15 + $0x20] sm:$0x1] }
  0x26   : > { %v643_v15 = vunpack.c.l.b16 %v603_v11  ;;  %v467_v22 = vor.u32 %v466_v13, %v463_v9  ;;  %v472_v23 = vrot.slane %v470_v14, 5  ;;  %v605_v26 = vshrl.u32 %v2611_v10, 16 }
  0x27   : > { %v476_v29 = vrot.slane %v474_v18, 4  ;;  %v608_v30 = vshll.u32 %v2611_v10, 16  ;;  %v482_v33 = vrot.slane %v480_v19, 5  ;;  %v614_v35 = vshll.u32 %v2619_v20, 16 }
  0x28   : > { %v2628_v28 = vpack.c.b16 %v643_v15, %v642_v5  ;;  %v468_v32 = vrot.slane %v467_v22, 4  ;;  %v607_v34 = vrot.slane %v605_v26, 4  ;;  %v618_v39 = vshrl.u32 %v2619_v20, 16  ;;  %v411_v22 = vld [vmem:[%s2563_s15 + $0x24] sm:$0xf] }
  0x29   : > { %v477_v37 = vor.u32 %v476_v29, %v472_v23  ;;  %v610_v38 = vrot.slane %v608_v30, 5  ;;  %v624_v41 = vshll.u32 %v2622_v25, 16  ;;  %v2637_v42 = vpack.c.b16 %v920_v21, %v919_v12  ;;  %v412_v26 = vld [vmem:[%s2563_s15 + $0x28] sm:$0xf] }
  0x2a   : > { %2133 = vmatmul.msk.bf16.vlgmr.msra.gmra.mxu3 %vm654_vm3, %v2628_v28  ;;  %v473_v43 = vsel %vm2592_vm7, %v468_v32, %v472_v23  ;;  %v616_v44 = vrot.slane %v614_v35, 5  ;;  %2168 = vmatmul.msk.bf16.gmra.mxu1 %vm654_vm3, %v2626_v27  ;;  %v620_v47 = vrot.slane %v618_v39, 4  ;;  %v875_v49 = vrot.slane %v409_v36, 5  ;;  %v2666_v23 = vld [vmem:[%s2563_s15 + $0x18] sm:$0xff] }
  0x2b   : > { %2359 = vmatpush.bf16.msra.mxu3 %v2537_v1  ;;  %v478_v45 = vrot.slane %v477_v37, 4  ;;  %v611_v46 = vor.u32 %v610_v38, %v607_v34  ;;  %v632_v50 = vunpack.c.l.b16 %v473_v43  ;;  %v626_v54 = vrot.slane %v624_v41, 5 }
  0x2c   : > { %v621_v53 = vor.u32 %v620_v47, %v616_v44  ;;  %v2177_v57 = vrot.slane %v408_v48, 9  ;;  %v485_v58 = vshrl.u32 %v408_v48, 16  ;;  %v488_v59 = vshll.u32 %v408_v48, 16  ;;  %v413_v48 = vld [vmem:[%s2563_s15 + $0x2c] sm:$0x1] }
  0x2d   : > { %v483_v51 = vsel %vm2592_vm7, %v478_v45, %v482_v33  ;;  %v612_v52 = vrot.slane %v611_v46, 4  ;;  %v877_v61 = vrot.slane %v875_v49, 4  ;;  %v494_v62 = vshll.u32 %v409_v36, 16 }
  0x2e   : > { %v633_v56 = vunpack.c.l.b16 %v483_v51  ;;  %v622_v60 = vrot.slane %v621_v53, 4  ;;  %v878_v0 = vrot.slane %v410_v55, 5  ;;  %v487_v2 = vrot.slane %v485_v58, 4 }
  0x2f   : > { %v617_v1 = vsel %vm2592_vm7, %v612_v52, %v616_v44  ;;  %v490_v3 = vrot.slane %v488_v59, 5  ;;  %v496_v6 = vrot.slane %v494_v62, 5  ;;  %v498_v7 = vshrl.u32 %v409_v36, 16 }
  0x30   : > { %2185 = vmatmul.msk.bf16.gmra.mxu2 %vm654_vm3, %v2637_v42  ;;  %v2652_v63 = vpack.c.b16 %v633_v56, %v632_v50  ;;  %v627_v4 = vsel %vm2592_vm7, %v622_v60, %v626_v54  ;;  %v644_v5 = vunpack.c.l.b16 %v617_v1  ;;  %v504_v12 = vshll.u32 %v410_v55, 16  ;;  %v414_v60 = vld [vmem:[%s2563_s15 + $0x30] sm:$0xf] }
  0x31   : > { %v645_v9 = vunpack.c.l.b16 %v627_v4  ;;  %v491_v11 = vor.u32 %v490_v3, %v487_v2  ;;  %v500_v13 = vrot.slane %v498_v7, 4  ;;  %v876_v14 = vsel %vm2565_vm4, %v2177_v57, %v875_v49  ;;  %v415_v4 = vld [vmem:[%s2563_s15 + $0x34] sm:$0xf]  ;;  %v2703_v7 = vld [vmem:[%s2563_s15 + $0x24] sm:$0xff] }
  0x32   : > { %v879_v15 = vsel %vm2565_vm4, %v877_v61, %v878_v0  ;;  %v506_v21 = vrot.slane %v504_v12, 5  ;;  %v921_v29 = vunpack.c.l.b16 %v876_v14  ;;  %v509_v33 = vshrl.u32 %v411_v22, 16  ;;  %v2699_v0 = vld [vmem:[%s2563_s15 + $0x48] sm:$0xff] }
  0x33   : > { %v2662_v17 = vpack.c.b16 %v645_v9, %v644_v5  ;;  %v492_v18 = vrot.slane %v491_v11, 4  ;;  %v501_v19 = vor.u32 %v500_v13, %v496_v6  ;;  %v922_v30 = vunpack.c.l.b16 %v879_v15 }
  0x34   : > { %v512_v34 = vshll.u32 %v411_v22, 16  ;;  %v518_v37 = vshll.u32 %v412_v26, 16  ;;  %v522_v38 = vshrl.u32 %v412_v26, 16  ;;  %v903_v39 = vrot.slane %v2578_v24, 5 }
  0x35   : > { %2128 = vmatmul.msk.bf16.gmra.mxu0 %vm654_vm3, %v2652_v63  ;;  %v502_v32 = vrot.slane %v501_v19, 4  ;;  %v497_v35 = vsel %vm2592_vm7, %v492_v18, %v496_v6  ;;  %v2678_v41 = vpack.c.b16 %v922_v30, %v921_v29  ;;  %v882_v43 = vrot.slane %v412_v26, 5 }
  0x36   : > { %v634_v44 = vunpack.c.l.b16 %v497_v35  ;;  %v511_v46 = vrot.slane %v509_v33, 4  ;;  %v514_v47 = vrot.slane %v512_v34, 5  ;;  %v520_v49 = vrot.slane %v518_v37, 5  ;;  %v416_v35 = vld [vmem:[%s2563_s15 + $0x38] sm:$0x1] }
  0x37   : > { %v507_v36 = vsel %vm2592_vm7, %v502_v32, %v506_v21  ;;  %v524_v50 = vrot.slane %v522_v38, 4  ;;  %v2181_v51 = vrot.slane %v2573_v16, 9  ;;  %v905_v52 = vrot.slane %v903_v39, 4 }
  0x38   : > { %v635_v45 = vunpack.c.l.b16 %v507_v36  ;;  %v906_v53 = vrot.slane %v2583_v31, 5  ;;  %v2178_v24 = vrot.slane %v411_v22, 9  ;;  %v884_v55 = vrot.slane %v882_v43, 4  ;;  %v2192_v22 = vld [vmem:[%s3285_s2 + $0xc] sm:$0xf] }
  0x39   : > { %v885_v56 = vrot.slane %v413_v48, 5  ;;  %v515_v57 = vor.u32 %v514_v47, %v511_v46  ;;  %v525_v58 = vor.u32 %v524_v50, %v520_v49  ;;  %v528_v59 = vshll.u32 %v413_v48, 16 }
  0x3a   : > { %2134 = vmatmul.msk.bf16.gmra.mxu3 %vm654_vm3, %v2662_v17  ;;  %2169 = vmatmul.msk.bf16.gmra.mxu1 %vm654_vm3, %v2666_v23  ;;  %v2685_v54 = vpack.c.b16 %v635_v45, %v634_v44  ;;  %v883_v16 = vsel %vm2565_vm4, %v2178_v24, %v882_v43  ;;  %v904_v61 = vsel %vm2565_vm4, %v2181_v51, %v903_v39  ;;  %v533_v12 = vshrl.u32 %v414_v60, 16 }
  0x3b   : > { %v886_v31 = vsel %vm2565_vm4, %v884_v55, %v885_v56  ;;  %v516_v1 = vrot.slane %v515_v57, 4  ;;  %v907_v62 = vsel %vm2565_vm4, %v905_v52, %v906_v53  ;;  %v526_v2 = vrot.slane %v525_v58, 4  ;;  %v2740_v58 = vld [vmem:[%s2563_s15 + $0x54] sm:$0xff] }
  0x3c   : > { %v530_v3 = vrot.slane %v528_v59, 5  ;;  %v929_v5 = vunpack.c.l.b16 %v904_v61  ;;  %v930_v6 = vunpack.c.l.b16 %v907_v62  ;;  %v923_v9 = vunpack.c.l.b16 %v883_v16  ;;  %v2743_v16 = vld [vmem:[%s2563_s15 + $0x30] sm:$0xff] }
  0x3d   : > { %v924_v11 = vunpack.c.l.b16 %v886_v31  ;;  %v521_v14 = vsel %vm2592_vm7, %v516_v1, %v520_v49  ;;  %v536_v15 = vshll.u32 %v414_v60, 16  ;;  %v542_v18 = vshll.u32 %v415_v4, 16  ;;  %v417_v31 = vld [vmem:[%s2563_s15 + $0x3c] sm:$0xf]  ;;  %v418_v1 = vld [vmem:[%s2563_s15 + $0x40] sm:$0xf] }
  0x3e   : > { %v2705_v13 = vpack.c.b16 %v930_v6, %v929_v5  ;;  %v546_v19 = vshrl.u32 %v415_v4, 16  ;;  %v531_v21 = vsel %vm2592_vm7, %v526_v2, %v530_v3  ;;  %v1044_v26 = vsel %vm679_vm0, %v2192_v22, 0 }
  0x3f   : > { %v2719_v29 = vpack.c.b16 %v924_v11, %v923_v9  ;;  %v636_v30 = vunpack.c.l.b16 %v521_v14  ;;  %v889_v32 = vrot.slane %v415_v4, 5  ;;  %v535_v33 = vrot.slane %v533_v12, 4 }
  0x40   : > { %2186 = vmatmul.msk.bf16.gmra.mxu2 %vm654_vm3, %v2678_v41  ;;  %v637_v34 = vunpack.c.l.b16 %v531_v21  ;;  %v538_v36 = vrot.slane %v536_v15, 5  ;;  %v544_v37 = vrot.slane %v542_v18, 5  ;;  %v548_v38 = vrot.slane %v546_v19, 4  ;;  %v419_v18 = vld [vmem:[%s2563_s15 + $0x44] sm:$0x1] }
  0x41   : > { %v2179_v39 = vrot.slane %v414_v60, 9  ;;  %v891_v43 = vrot.slane %v889_v32, 4  ;;  %v892_v44 = vrot.slane %v416_v35, 5  ;;  %v552_v45 = vshll.u32 %v416_v35, 16 }
  0x42   : > { %v2724_v46 = vpack.c.b16 %v637_v34, %v636_v30  ;;  %v539_v47 = vor.u32 %v538_v36, %v535_v33  ;;  %v549_v48 = vor.u32 %v548_v38, %v544_v37  ;;  %v910_v49 = vrot.slane %v2619_v20, 5 }
  0x43   : > { %v2182_v50 = vrot.slane %v2611_v10, 9  ;;  %v913_v52 = vrot.slane %v2622_v25, 5  ;;  %v890_v53 = vsel %vm2565_vm4, %v2179_v39, %v889_v32  ;;  %v893_v24 = vsel %vm2565_vm4, %v891_v43, %v892_v44 }
  0x44   : > { %v912_v51 = vrot.slane %v910_v49, 4  ;;  %v554_v55 = vrot.slane %v552_v45, 5  ;;  %v540_v56 = vrot.slane %v539_v47, 4  ;;  %v550_v57 = vrot.slane %v549_v48, 4  ;;  %v2771_v47 = vld [vmem:[%s2563_s15 + $0x3c] sm:$0xff]  ;;  %s2362_s15 = smul.u32 3, %s3307_s13  ;;  %s3126_s13 = scalar_lea.vmem %s3291_s8, %s2125_s27 }
  0x45   : > { %2129 = vmatmul.msk.bf16.gmra.mxu0 %vm654_vm3, %v2685_v54  ;;  %v911_v20 = vsel %vm2565_vm4, %v2182_v50, %v910_v49  ;;  %v925_v60 = vunpack.c.l.b16 %v890_v53  ;;  %v926_v61 = vunpack.c.l.b16 %v893_v24  ;;  %v557_v4 = vshrl.u32 %v417_v31, 16  ;;  %v2224_v53 = vld [vmem:[%s3285_s2 + $0x18] sm:$0xf]  ;;  %v2215_v24 = vld [vmem:[%s3285_s2 + $0x14] sm:$0xf] }
  0x46   : > { %v914_v10 = vsel %vm2565_vm4, %v912_v51, %v913_v52  ;;  %v931_v25 = vunpack.c.l.b16 %v911_v20  ;;  %v545_v2 = vsel %vm2592_vm7, %v540_v56, %v544_v37  ;;  %v555_v3 = vsel %vm2592_vm7, %v550_v57, %v554_v55  ;;  %v2237_v52 = vld [vmem:[%s3285_s2 + $0x1c] sm:$0xf]  ;;  %v2247_v20 = vld [vmem:[%s3285_s2 + $0x20] sm:$0xf]  ;;  %s385_s14 = sadd.s32 %s2362_s15, %s2361_s23 }
  0x47   : > { %v932_v59 = vunpack.c.l.b16 %v914_v10  ;;  %v560_v5 = vshll.u32 %v417_v31, 16  ;;  %v566_v6 = vshll.u32 %v418_v1, 16  ;;  %v570_v9 = vshrl.u32 %v418_v1, 16  ;;  %s2122_s16 = sshll.u32 %s385_s14, 2 }
  0x48   : > { %v2757_v11 = vpack.c.b16 %v926_v61, %v925_v60  ;;  %v638_v12 = vunpack.c.l.b16 %v545_v2  ;;  %v639_v14 = vunpack.c.l.b16 %v555_v3  ;;  %v896_v15 = vrot.slane %v418_v1, 5  ;;  %s2875_s20 = scalar_lea.vmem %s3284_s1, %s2122_s16 }
  0x49   : > { %v2747_v62 = vpack.c.b16 %v932_v59, %v931_v25  ;;  %v559_v19 = vrot.slane %v557_v4, 4  ;;  %v562_v21 = vrot.slane %v560_v5, 5  ;;  %v568_v22 = vrot.slane %v566_v6, 5 }
  0x4a   : > { %2173 = vmatmul.msk.bf16.vlgmr.msrb.gmra.mxu3 %vm654_vm3, %v2699_v0  ;;  %2170 = vmatmul.msk.bf16.gmra.mxu1 %vm654_vm3, %v2703_v7  ;;  %v2762_v30 = vpack.c.b16 %v639_v14, %v638_v12  ;;  %v2180_v32 = vrot.slane %v417_v31, 9  ;;  %v898_v33 = vrot.slane %v896_v15, 4  ;;  %v899_v34 = vrot.slane %v419_v18, 5 }
  0x4b   : > { %1053 = vmatpush.bf16.msrb.mxu3 %v1044_v26  ;;  %v572_v26 = vrot.slane %v570_v9, 4  ;;  %v563_v35 = vor.u32 %v562_v21, %v559_v19  ;;  %v576_v37 = vshll.u32 %v419_v18, 16  ;;  %v1406_v55 = vsel %vm679_vm0, %v2237_v52, 0 }
  0x4c   : > { %v897_v38 = vsel %vm2565_vm4, %v2180_v32, %v896_v15  ;;  %v900_v39 = vsel %vm2565_vm4, %v898_v33, %v899_v34  ;;  %v1306_v56 = vsel %vm679_vm0, %v2224_v53, 0  ;;  %v1228_v57 = vsel %vm679_vm0, %v2215_v24, 0 }
  0x4d   : > { %v573_v36 = vor.u32 %v572_v26, %v568_v22  ;;  %v564_v43 = vrot.slane %v563_v35, 4  ;;  %v578_v45 = vrot.slane %v576_v37, 5  ;;  %v927_v48 = vunpack.c.l.b16 %v897_v38  ;;  %1315 = vmatpush.bf16.msrb.mxu2 %v1306_v56  ;;  %1237 = vmatpush.bf16.msrb.mxu1 %v1228_v57  ;;  %v426_v56 = vld [vmem:[%s2875_s20] sm:$0xf]  ;;  %v427_v57 = vld [vmem:[%s2875_s20 + $0x4] sm:$0xf] }
  0x4e   : > { %v928_v49 = vunpack.c.l.b16 %v900_v39  ;;  %v1490_v25 = vsel %vm679_vm0, %v2247_v20, 0  ;;  %v1112_v20 = vshrl.u32 %v426_v56, 16 }
  0x4f   : > { %v574_v44 = vrot.slane %v573_v36, 4  ;;  %v569_v50 = vsel %vm2592_vm7, %v564_v43, %v568_v22  ;;  %1499 = vmatpush.bf16.msra.mxu0 %v1490_v25 }
  0x50   : > { %2187 = vmatmul.msk.bf16.gmra.mxu2 %vm654_vm3, %v2719_v29  ;;  %v2796_v10 = vpack.c.b16 %v928_v49, %v927_v48  ;;  %v640_v59 = vunpack.c.l.b16 %v569_v50 }
  0x51   : > { %v579_v51 = vsel %vm2592_vm7, %v574_v44, %v578_v45 }
  0x52   : > { %v641_v31 = vunpack.c.l.b16 %v579_v51 }
  0x54   : > { %v2801_v1 = vpack.c.b16 %v641_v31, %v640_v59  ;;  %v1115_v59 = vshll.u32 %v426_v56, 16  ;;  %v1121_v31 = vshll.u32 %v427_v57, 16 }
  0x55   : > { %2130 = vmatmul.msk.bf16.gmra.mxu0 %vm654_vm3, %v2724_v46 }
  0x5a   : > { %2174 = vmatmul.msk.bf16.gmra.mxu3 %vm654_vm3, %v2740_v58  ;;  %2171 = vmatmul.msk.bf16.gmra.mxu1 %vm654_vm3, %v2743_v16 }
  0x60   : > { %2188 = vmatmul.msk.bf16.gmra.mxu2 %vm654_vm3, %v2757_v11 }
  0x65   : > { %2131 = vmatmul.msk.bf16.gmra.mxu0 %vm654_vm3, %v2762_v30 }
  0x6a   : > { %2190 = vmatmul.msk.bf16.vlgmr.msra.gmra.mxu3 %vm654_vm3, %v2705_v13  ;;  %2172 = vmatmul.msk.bf16.gmra.mxu1 %vm654_vm3, %v2771_v47 }
  0x6b   : > { %1415 = vmatpush.bf16.msra.mxu3 %v1406_v55 }
  0x70   : > { %2189 = vmatmul.msk.bf16.gmra.mxu2 %vm654_vm3, %v2796_v10 }
  0x75   : > { %2132 = vmatmul.msk.bf16.gmra.mxu0 %vm654_vm3, %v2801_v1 }
  0x7a   : > { %2191 = vmatmul.msk.bf16.gmra.mxu3 %vm654_vm3, %v2747_v62  ;;  %2216 = vmatmul.msk.bf16.vlgmr.msrb.gmra.mxu1 %vm654_vm3, %v2637_v42 }
  0x80   : > { %2229 = vmatmul.msk.bf16.vlgmr.msrb.gmra.mxu2 %vm654_vm3, %v2666_v23 }
  0x85   : > { %2206 = vmatmul.msk.bf16.vlgmr.msrb.gmra.mxu0 %vm654_vm3, %v2652_v63 }
  0x8a   : > { %2197 = vmatmul.msk.bf16.vlgmr.msrb.gmra.mxu3 %vm654_vm3, %v2626_v27  ;;  %2217 = vmatmul.msk.bf16.gmra.mxu1 %vm654_vm3, %v2678_v41 }
  0x90   : > { %2230 = vmatmul.msk.bf16.gmra.mxu2 %vm654_vm3, %v2703_v7 }
  0x95   : > { %2207 = vmatmul.msk.bf16.gmra.mxu0 %vm654_vm3, %v2685_v54 }
  0x97   : > { %v808_v60 = vpop.f32.mrf.mxu1 }
  0x9a   : > { %2198 = vmatmul.msk.bf16.gmra.mxu3 %vm654_vm3, %v2666_v23  ;;  %2218 = vmatmul.msk.bf16.gmra.mxu1 %vm654_vm3, %v2719_v29 }
  0x9f   : > { %v810_v42 = vpop.f32.mrf.mxu1 }
  0xa0   : > { %2231 = vmatmul.msk.bf16.gmra.mxu2 %vm654_vm3, %v2743_v16 }
  0xa2   : > { %v692_v27 = vpop.f32.mrf.mxu0 }
  0xa3   : > { %v809_v63 = vadd.f32 %v808_v60, %v692_v27  ;;  %v977_v61 = vpop.f32.mrf.mxu2  ;;  %v1125_v60 = vshrl.u32 %v427_v57, 16  ;;  %v1214_v27 = vrot.slane %v427_v57, 5 }
  0xa5   : > { %v2827_v2 = vadd.f32 %v977_v61, %v809_v63  ;;  %2208 = vmatmul.msk.bf16.gmra.mxu0 %vm654_vm3, %v2724_v46  ;;  %v2337_v63 = vld [vmem:[%s2875_s20] sm:$0xff]  ;;  %v428_v61 = vld [vmem:[%s2875_s20 + $0x8] sm:$0x1] }
  0xa7   : > { %v813_v3 = vpop.f32.mrf.mxu1 }
  0xaa   : > { %2199 = vmatmul.msk.bf16.gmra.mxu3 %vm654_vm3, %v2703_v7  ;;  %v694_v23 = vpop.f32.mrf.mxu0  ;;  %2219 = vmatmul.msk.bf16.gmra.mxu1 %vm654_vm3, %v2757_v11 }
  0xab   : > { %v811_v4 = vadd.f32 %v810_v42, %v694_v23  ;;  %v979_v5 = vpop.f32.mrf.mxu2  ;;  %v1114_v23 = vrot.slane %v1112_v20, 4 }
  0xad   : > { %v722_v6 = vpop.f32.mrf.mxu3  ;;  %v2835_v9 = vadd.f32 %v979_v5, %v811_v4  ;;  %v2214_v4 = vrot.slane %v426_v56, 9  ;;  %v1216_v5 = vrot.slane %v1214_v27, 4 }
  0xaf   : > { %v815_v12 = vpop.f32.mrf.mxu1 }
  0xb0   : > { %2232 = vmatmul.msk.bf16.gmra.mxu2 %vm654_vm3, %v2771_v47 }
  0xb2   : > { %v697_v14 = vpop.f32.mrf.mxu0 }
  0xb3   : > { %v814_v15 = vadd.f32 %v813_v3, %v697_v14  ;;  %v982_v18 = vpop.f32.mrf.mxu2  ;;  %v1117_v14 = vrot.slane %v1115_v59, 5 }
  0xb5   : > { %v724_v19 = vpop.f32.mrf.mxu3  ;;  %v2839_v21 = vadd.f32 %v982_v18, %v814_v15  ;;  %2209 = vmatmul.msk.bf16.gmra.mxu0 %vm654_vm3, %v2762_v30  ;;  %v1123_v15 = vrot.slane %v1121_v31, 5  ;;  %v1127_v18 = vrot.slane %v1125_v60, 4 }
  0xb7   : > { %v818_v7 = vpop.f32.mrf.mxu1 }
  0xba   : > { %2200 = vmatmul.msk.bf16.gmra.mxu3 %vm654_vm3, %v2743_v16  ;;  %v699_v22 = vpop.f32.mrf.mxu0  ;;  %2220 = vmatmul.msk.bf16.gmra.mxu1 %vm654_vm3, %v2796_v10 }
  0xbb   : > { %v816_v26 = vadd.f32 %v815_v12, %v699_v22  ;;  %v984_v32 = vpop.f32.mrf.mxu2 }
  0xbd   : > { %v727_v33 = vpop.f32.mrf.mxu3  ;;  %v2847_v34 = vadd.f32 %v984_v32, %v816_v26  ;;  %v1118_v26 = vor.u32 %v1117_v14, %v1114_v23  ;;  %v1128_v32 = vor.u32 %v1127_v18, %v1123_v15 }
  0xbf   : > { %v2850_v35 = vpop.f32.mrf.mxu1 }
  0xc0   : > { %2233 = vmatmul.msk.bf16.gmra.mxu2 %vm654_vm3, %v2699_v0 }
  0xc2   : > { %v702_v36 = vpop.f32.mrf.mxu0 }
  0xc3   : > { %v819_v37 = vadd.f32 %v818_v7, %v702_v36  ;;  %v987_v16 = vpop.f32.mrf.mxu2  ;;  %v1131_v36 = vshll.u32 %v428_v61, 16 }
  0xc5   : > { %v729_v38 = vpop.f32.mrf.mxu3  ;;  %v2854_v39 = vadd.f32 %v987_v16, %v819_v37  ;;  %2210 = vmatmul.msk.bf16.gmra.mxu0 %vm654_vm3, %v2801_v1  ;;  %v1133_v56 = vrot.slane %v1131_v36, 5 }
  0xc7   : > { %v823_v44 = vpop.f32.mrf.mxu1 }
  0xca   : > { %2201 = vmatmul.msk.bf16.gmra.mxu3 %vm654_vm3, %v2771_v47  ;;  %v2860_v43 = vpop.f32.mrf.mxu0  ;;  %2221 = vmatmul.msk.bf16.gmra.mxu1 %vm654_vm3, %v2705_v13 }
  0xcb   : > { %v2862_v45 = vpop.f32.mrf.mxu2 }
  0xcd   : > { %v838_v48 = vpop.f32.mrf.mxu3 }
  0xce   : > { %v2868_v49 = vadd.f32 %v838_v48, %v722_v6  ;;  %v1217_v6 = vrot.slane %v428_v61, 5 }
  0xcf   : > { %v2877_v52 = vpop.f32.mrf.mxu1 }
  0xd0   : > { %2234 = vmatmul.msk.bf16.gmra.mxu2 %vm654_vm3, %v2740_v58  ;;  %v1218_v7 = vsel %vm2565_vm4, %v1216_v5, %v1217_v6 }
  0xd2   : > { %v707_v50 = vpop.f32.mrf.mxu0 }
  0xd3   : > { %v824_v51 = vadd.f32 %v823_v44, %v707_v50  ;;  %v992_v47 = vpop.f32.mrf.mxu2 }
  0xd5   : > { %v840_v53 = vpop.f32.mrf.mxu3  ;;  %v2879_v24 = vadd.f32 %v992_v47, %v824_v51  ;;  %2211 = vmatmul.msk.bf16.gmra.mxu0 %vm654_vm3, %v2628_v28  ;;  %v1119_v47 = vrot.slane %v1118_v26, 4  ;;  %v2346_v26 = vld [vmem:[%s3287_s4 + $0x38] sm:$0xff] }
  0xd6   : > { %v2883_v55 = vadd.f32 %v840_v53, %v724_v19  ;;  %v1215_v19 = vsel %vm2565_vm4, %v2214_v4, %v1214_v27  ;;  %v1129_v53 = vrot.slane %v1128_v32, 4  ;;  %1669 = vmatpush.bf16.msra.mxu1 %v2346_v26 }
  0xd7   : > { %v1221_v44 = vunpack.c.l.b16 %v1215_v19  ;;  %v1124_v31 = vsel %vm2592_vm7, %v1119_v47, %v1123_v15 }
  0xd8   : > { %v1134_v60 = vsel %vm2592_vm7, %v1129_v53, %v1133_v56  ;;  %v2344_v53 = vld [vmem:[%s3287_s4 + $0x28] sm:$0xff] }
  0xd9   : > { %v1138_v23 = vunpack.c.l.b16 %v1134_v60 }
  0xda   : > { %2202 = vmatmul.msk.bf16.gmra.mxu3 %vm654_vm3, %v2699_v0  ;;  %v2889_v25 = vpop.f32.mrf.mxu0  ;;  %2222 = vmatmul.msk.bf16.gmra.mxu1 %vm654_vm3, %v2747_v62  ;;  %v828_v0 = vpop.f32.mrf.mxu1 }
  0xdb   : > { %v2891_v42 = vpop.f32.mrf.mxu2 }
  0xdd   : > { %v843_v3 = vpop.f32.mrf.mxu3 }
  0xde   : > { %v844_v12 = vadd.f32 %v843_v3, %v727_v33  ;;  %v1222_v33 = vunpack.c.l.b16 %v1218_v7  ;;  %v1137_v3 = vunpack.c.l.b16 %v1124_v31 }
  0xe0   : > { %2235 = vmatmul.msk.bf16.gmra.mxu2 %vm654_vm3, %v2337_v63  ;;  %v2906_v57 = vpack.c.b16 %v1222_v33, %v1221_v44 }
  0xe2   : > { %v712_v22 = vpop.f32.mrf.mxu0  ;;  %v2908_v20 = vpop.f32.mrf.mxu1 }
  0xe3   : > { %v829_v37 = vadd.f32 %v828_v0, %v712_v22  ;;  %v997_v16 = vpop.f32.mrf.mxu2 }
  0xe5   : > { %v845_v48 = vpop.f32.mrf.mxu3  ;;  %v2902_v50 = vadd.f32 %v997_v16, %v829_v37  ;;  %2212 = vmatmul.msk.bf16.gmra.mxu0 %vm654_vm3, %v2662_v17  ;;  %v2345_v16 = vld [vmem:[%s3287_s4 + $0x30] sm:$0xff] }
  0xe6   : > { %v846_v51 = vadd.f32 %v845_v48, %v729_v38  ;;  %v2338_v38 = vld [vmem:[%s2875_s20 + $0xc] sm:$0xff]  ;;  %1670 = vmatpush.bf16.msra.mxu1 %v2345_v16 }
  0xe7   : > { %v429_v16 = vld [vmem:[%s2875_s20 + $0xc] sm:$0xf] }
  0xea   : > { %2203 = vmatmul.msk.bf16.gmra.mxu3 %vm654_vm3, %v2740_v58  ;;  %v2912_v59 = vpop.f32.mrf.mxu0  ;;  %2223 = vmatmul.msk.bf16.gmra.mxu1 %vm654_vm3, %v2906_v57  ;;  %v2927_v58 = vpack.c.b16 %v1138_v23, %v1137_v3  ;;  %v833_v6 = vpop.f32.mrf.mxu1  ;;  %v821_v3 = vadd.f32 %v2850_v35, %v2860_v43  ;;  %v2342_v43 = vld [vmem:[%s3287_s4 + $0x18] sm:$0xff] }
  0xeb   : > { %v2918_v27 = vpop.f32.mrf.mxu2  ;;  %1671 = vmatpush.bf16.msra.mxu1 %v2344_v53 }
  0xed   : > { %v1007_v61 = vpop.f32.mrf.mxu3 }
  0xee   : > { %v2924_v4 = vadd.f32 %v1007_v61, %v2868_v49  ;;  %v2343_v61 = vld [vmem:[%s3287_s4 + $0x20] sm:$0xff] }
  0xef   : > { %1672 = vmatpush.bf16.msra.mxu1 %v2343_v61  ;;  %v431_v61 = vld [vmem:[%s2875_s20 + $0x14] sm:$0x1] }
  0xf0   : > { %2236 = vmatmul.msk.bf16.gmra.mxu2 %vm654_vm3, %v2338_v38 }
  0xf2   : > { %v717_v5 = vpop.f32.mrf.mxu0 }
  0xf3   : > { %v834_v0 = vadd.f32 %v833_v6, %v717_v5  ;;  %v1002_v14 = vpop.f32.mrf.mxu2  ;;  %1673 = vmatpush.bf16.msra.mxu1 %v2342_v43 }
  0xf5   : > { %v1009_v15 = vpop.f32.mrf.mxu3  ;;  %v2929_v18 = vadd.f32 %v1002_v14, %v834_v0  ;;  %2213 = vmatmul.msk.bf16.gmra.mxu0 %vm654_vm3, %v2927_v58 }
  0xf6   : > { %v2934_v19 = vadd.f32 %v1009_v15, %v2883_v55 }
  0xfa   : > { %2204 = vmatmul.msk.bf16.gmra.mxu3 %vm654_vm3, %v2337_v63  ;;  %v2937_v49 = vpop.f32.mrf.mxu0 }
  0xfd   : > { %v1012_v7 = vpop.f32.mrf.mxu3 }
  0xfe   : > { %v2939_v22 = vadd.f32 %v1012_v7, %v844_v12 }
 0x102   : > { %v1155_v32 = vpop.f32.mrf.mxu0 }
 0x105   : > { %v1014_v36 = vpop.f32.mrf.mxu3  ;;  %2248 = vmatmul.msk.bf16.vlgmr.msra.gmra.mxu0 %vm654_vm3, %v2678_v41 }
 0x106   : > { %v2946_v37 = vadd.f32 %v1014_v36, %v846_v51 }
 0x10a   : > { %2238 = vmatmul.msk.bf16.vlgmr.msra.gmra.mxu3 %vm654_vm3, %v2685_v54  ;;  %v1157_v55 = vpop.f32.mrf.mxu0 }
 0x10d   : > { %v1055_v63 = vpop.f32.mrf.mxu3 }
 0x10e   : > { %v1095_v12 = vadd.f32 %v1055_v63, %v2827_v2 }
 0x110   : > { %v2954_v44 = vadd.f32 %v1155_v32, %v1095_v12  ;;  %v831_v32 = vadd.f32 %v2908_v20, %v2912_v59  ;;  %v835_v20 = vpop.f32.mrf.mxu1 }
 0x112   : > { %v1160_v33 = vpop.f32.mrf.mxu0 }
 0x115   : > { %v1057_v48 = vpop.f32.mrf.mxu3  ;;  %2249 = vmatmul.msk.bf16.gmra.mxu0 %vm654_vm3, %v2719_v29 }
 0x116   : > { %v1096_v41 = vadd.f32 %v1057_v48, %v2835_v9 }
 0x118   : > { %v2959_v51 = vadd.f32 %v1157_v55, %v1096_v41  ;;  %v1026_v55 = vadd.f32 %v2918_v27, %v831_v32  ;;  %v2340_v27 = vld [vmem:[%s3287_s4 + $0x8] sm:$0xff]  ;;  %v1374_v41 = vshrl.u32 %v429_v16, 16 }
 0x11a   : > { %2239 = vmatmul.msk.bf16.gmra.mxu3 %vm654_vm3, %v2724_v46  ;;  %v1162_v54 = vpop.f32.mrf.mxu0 }
 0x11d   : > { %v1060_v2 = vpop.f32.mrf.mxu3 }
 0x11e   : > { %v1097_v47 = vadd.f32 %v1060_v2, %v2839_v21 }
 0x120   : > { %v2967_v56 = vadd.f32 %v1160_v33, %v1097_v47  ;;  %v430_v33 = vld [vmem:[%s2875_s20 + $0x10] sm:$0xf]  ;;  %v836_v47 = vadd.f32 %v835_v20, %v2937_v49 }
 0x121   : > { %v1387_v2 = vshrl.u32 %v430_v33, 16 }
 0x122   : > { %v1165_v31 = vpop.f32.mrf.mxu0 }
 0x125   : > { %v1062_v29 = vpop.f32.mrf.mxu3  ;;  %2250 = vmatmul.msk.bf16.gmra.mxu0 %vm654_vm3, %v2757_v11 }
 0x126   : > { %v1098_v9 = vadd.f32 %v1062_v29, %v2847_v34  ;;  %v1022_v34 = vadd.f32 %v2862_v45, %v821_v3  ;;  %v826_v45 = vadd.f32 %v2877_v52, %v2889_v25  ;;  %v1476_v29 = vrot.slane %v430_v33, 5 }
 0x128   : > { %v2972_v60 = vadd.f32 %v1162_v54, %v1098_v9  ;;  %v1024_v15 = vadd.f32 %v2891_v42, %v826_v45  ;;  %v2341_v42 = vld [vmem:[%s3287_s4 + $0x10] sm:$0xff]  ;;  %v1383_v54 = vshll.u32 %v430_v33, 16  ;;  %v1376_v9 = vrot.slane %v1374_v41, 4  ;;  %v2339_v33 = vld [vmem:[%s3287_s4] sm:$0xff] }
 0x129   : > { %1674 = vmatpush.bf16.msra.mxu1 %v2341_v42  ;;  %v1478_v49 = vrot.slane %v1476_v29, 4 }
 0x12a   : > { %2240 = vmatmul.msk.bf16.gmra.mxu3 %vm654_vm3, %v2762_v30  ;;  %v1167_v46 = vpop.f32.mrf.mxu0 }
 0x12d   : > { %v1065_v21 = vpop.f32.mrf.mxu3  ;;  %1675 = vmatpush.bf16.msra.mxu1 %v2340_v27 }
 0x12e   : > { %v1099_v38 = vadd.f32 %v1065_v21, %v2854_v39  ;;  %v1389_v21 = vrot.slane %v1387_v2, 4 }
 0x130   : > { %v2982_v23 = vadd.f32 %v1165_v31, %v1099_v38 }
 0x131   : > { %1676 = vmatpush.bf16.msra.mxu1 %v2339_v33 }
 0x132   : > { %v1170_v11 = vpop.f32.mrf.mxu0 }
 0x135   : > { %v1067_v5 = vpop.f32.mrf.mxu3  ;;  %2251 = vmatmul.msk.bf16.gmra.mxu0 %vm654_vm3, %v2796_v10 }
 0x136   : > { %v1100_v30 = vadd.f32 %v1067_v5, %v1022_v34  ;;  %v2246_v5 = vrot.slane %v429_v16, 9 }
 0x138   : > { %v2987_v6 = vadd.f32 %v1167_v46, %v1100_v30  ;;  %v1479_v30 = vrot.slane %v431_v61, 5 }
 0x13a   : > { %2241 = vmatmul.msk.bf16.gmra.mxu3 %vm654_vm3, %v2801_v1  ;;  %v1172_v39 = vpop.f32.mrf.mxu0 }
 0x13d   : > { %v1070_v0 = vpop.f32.mrf.mxu3 }
 0x13e   : > { %v1101_v35 = vadd.f32 %v1070_v0, %v2879_v24 }
 0x140   : > { %v2997_v14 = vadd.f32 %v1170_v11, %v1101_v35  ;;  %v1239_v11 = vpop.f32.mrf.mxu1  ;;  %v1393_v35 = vshll.u32 %v431_v61, 16 }
 0x142   : > { %v1175_v10 = vpop.f32.mrf.mxu0 }
 0x145   : > { %v1072_v7 = vpop.f32.mrf.mxu3  ;;  %2252 = vmatmul.msk.bf16.gmra.mxu0 %vm654_vm3, %v2705_v13 }
 0x146   : > { %v1102_v1 = vadd.f32 %v1072_v7, %v1024_v15 }
 0x148   : > { %v3002_v26 = vadd.f32 %v1172_v39, %v1102_v1 }
 0x14a   : > { %2242 = vmatmul.msk.bf16.gmra.mxu3 %vm654_vm3, %v2628_v28  ;;  %v1177_v24 = vpop.f32.mrf.mxu0 }
 0x14d   : > { %v1075_v52 = vpop.f32.mrf.mxu3 }
 0x14e   : > { %v1103_v25 = vadd.f32 %v1075_v52, %v2902_v50 }
 0x150   : > { %v3012_v13 = vadd.f32 %v1175_v10, %v1103_v25  ;;  %v1477_v10 = vsel %vm2565_vm4, %v2246_v5, %v1476_v29 }
 0x151   : > { %v1483_v25 = vunpack.c.l.b16 %v1477_v10 }
 0x152   : > { %v1180_v36 = vpop.f32.mrf.mxu0 }
 0x155   : > { %v1077_v28 = vpop.f32.mrf.mxu3  ;;  %2253 = vmatmul.msk.bf16.gmra.mxu0 %vm654_vm3, %v2747_v62  ;;  %v1377_v62 = vshll.u32 %v429_v16, 16 }
 0x156   : > { %v1104_v63 = vadd.f32 %v1077_v28, %v1026_v55  ;;  %v1241_v55 = vpop.f32.mrf.mxu1 }
 0x157   : > { %v1379_v46 = vrot.slane %v1377_v62, 5 }
 0x158   : > { %v3017_v12 = vadd.f32 %v1177_v24, %v1104_v63  ;;  %v1395_v24 = vrot.slane %v1393_v35, 5 }
 0x159   : > { %v1380_v39 = vor.u32 %v1379_v46, %v1376_v9 }
 0x15a   : > { %2243 = vmatmul.msk.bf16.gmra.mxu3 %vm654_vm3, %v2662_v17  ;;  %v1182_v50 = vpop.f32.mrf.mxu0  ;;  %v1004_v17 = vpop.f32.mrf.mxu2 }
 0x15b   : > { %v1028_v38 = vadd.f32 %v1004_v17, %v836_v47  ;;  %v1381_v7 = vrot.slane %v1380_v39, 4 }
 0x15d   : > { %v1080_v59 = vpop.f32.mrf.mxu3 }
 0x15e   : > { %v1105_v48 = vadd.f32 %v1080_v59, %v2929_v18  ;;  %v1385_v18 = vrot.slane %v1383_v54, 5  ;;  %v1244_v27 = vpop.f32.mrf.mxu1 }
 0x160   : > { %v3028_v53 = vadd.f32 %v1180_v36, %v1105_v48  ;;  %v1390_v0 = vor.u32 %v1389_v21, %v1385_v18  ;;  %v1386_v36 = vsel %vm2592_vm7, %v1381_v7, %v1385_v18  ;;  %v1279_v18 = vadd.f32 %v1239_v11, %v2954_v44  ;;  %v3070_v44 = vld [vmem:[%s3286_s3] ss:$0 sm:$0xff] }
 0x162   : > { %v1185_v31 = vpop.f32.mrf.mxu0  ;;  %v1317_v15 = vpop.f32.mrf.mxu2  ;;  %v1391_v1 = vrot.slane %v1390_v0, 4 }
 0x165   : > { %v1082_v3 = vpop.f32.mrf.mxu3  ;;  %2254 = vmatmul.msk.bf16.gmra.mxu0 %vm654_vm3, %v2906_v57  ;;  %v1480_v57 = vsel %vm2565_vm4, %v1478_v49, %v1479_v30 }
 0x166   : > { %v1106_v34 = vadd.f32 %v1082_v3, %v1028_v38  ;;  %v1484_v42 = vunpack.c.l.b16 %v1480_v57  ;;  %v2354_v38 = vld [vmem:[%s3289_s6 + $0x38] sm:$0xff]  ;;  %v1281_v57 = vadd.f32 %v1244_v27, %v2967_v56 }
 0x167   : > { %1810 = vmatpush.bf16.msra.mxu2 %v2354_v38 }
 0x168   : > { %v3033_v43 = vadd.f32 %v1182_v50, %v1106_v34  ;;  %v1485_v8 = vpack.c.b16 %v1484_v42, %v1483_v25  ;;  %v1399_v50 = vunpack.c.l.b16 %v1386_v36  ;;  %v1280_v34 = vadd.f32 %v1241_v55, %v2959_v51 }
 0x16a   : > { %2244 = vmatmul.msk.bf16.gmra.mxu3 %vm654_vm3, %v2927_v58  ;;  %v1187_v45 = vpop.f32.mrf.mxu0  ;;  %v1396_v58 = vsel %vm2592_vm7, %v1391_v1, %v1395_v24  ;;  %v1319_v20 = vpop.f32.mrf.mxu2  ;;  %v2353_v24 = vld [vmem:[%s3289_s6 + $0x30] sm:$0xff] }
 0x16b   : > { %v1400_v16 = vunpack.c.l.b16 %v1396_v58  ;;  %1811 = vmatpush.bf16.msra.mxu2 %v2353_v24 }
 0x16d   : > { %v1085_v52 = vpop.f32.mrf.mxu3  ;;  %v1401_v48 = vpack.c.b16 %v1400_v16, %v1399_v50 }
 0x16e   : > { %v1107_v32 = vadd.f32 %v1085_v52, %v2924_v4 }
 0x170   : > { %v3046_v28 = vadd.f32 %v1185_v31, %v1107_v32  ;;  %v1246_v31 = vpop.f32.mrf.mxu1 }
 0x171   : > { %v1282_v36 = vadd.f32 %v1246_v31, %v2972_v60 }
 0x172   : > { %v1190_v63 = vpop.f32.mrf.mxu0  ;;  %v1322_v2 = vpop.f32.mrf.mxu2 }
 0x173   : > { %v1359_v42 = vadd.f32 %v1322_v2, %v1281_v57 }
 0x175   : > { %v1087_v59 = vpop.f32.mrf.mxu3  ;;  %2255 = vmatmul.msk.bf16.gmra.mxu0 %vm654_vm3, %v1485_v8 }
 0x176   : > { %v1108_v4 = vadd.f32 %v1087_v59, %v2934_v19 }
 0x178   : > { %v3053_v40 = vadd.f32 %v1187_v45, %v1108_v4  ;;  %v1249_v3 = vpop.f32.mrf.mxu1 }
 0x179   : > { %v1283_v4 = vadd.f32 %v1249_v3, %v2982_v23 }
 0x17a   : > { %2245 = vmatmul.msk.bf16.gmra.mxu3 %vm654_vm3, %v1401_v48  ;;  %v1192_v41 = vpop.f32.mrf.mxu0  ;;  %v1324_v46 = vpop.f32.mrf.mxu2 }
 0x17b   : > { %v1360_v8 = vadd.f32 %v1324_v46, %v1282_v36 }
 0x17d   : > { %v1090_v62 = vpop.f32.mrf.mxu3 }
 0x17e   : > { %v1109_v54 = vadd.f32 %v1090_v62, %v2939_v22  ;;  %v1357_v22 = vadd.f32 %v1317_v15, %v1279_v18 }
 0x180   : > { %v3057_v47 = vadd.f32 %v1190_v63, %v1109_v54  ;;  %v1251_v35 = vpop.f32.mrf.mxu1  ;;  %v2352_v54 = vld [vmem:[%s3289_s6 + $0x28] sm:$0xff] }
 0x181   : > { %1812 = vmatpush.bf16.msra.mxu2 %v2352_v54 }
 0x182   : > { %v1501_v17 = vpop.f32.mrf.mxu0  ;;  %v1327_v30 = vpop.f32.mrf.mxu2 }
 0x185   : > { %v1092_v29 = vpop.f32.mrf.mxu3 }
 0x186   : > { %v1110_v9 = vadd.f32 %v1092_v29, %v2946_v37  ;;  %v1358_v37 = vadd.f32 %v1319_v20, %v1280_v34  ;;  %v1284_v29 = vadd.f32 %v1251_v35, %v2987_v6 }
 0x188   : > { %v3060_v19 = vadd.f32 %v1192_v41, %v1110_v9  ;;  %v1254_v55 = vpop.f32.mrf.mxu1 }
 0x18a   : > { %v1503_v21 = vpop.f32.mrf.mxu0  ;;  %v1329_v52 = vpop.f32.mrf.mxu2 }
 0x18b   : > { %v1362_v18 = vadd.f32 %v1329_v52, %v1284_v29 }
 0x18d   : > { %v1417_v61 = vpop.f32.mrf.mxu3 }
 0x18e   : > { %v1457_v5 = vadd.f32 %v1417_v61, %v1357_v22 }
 0x190   : > { %v1541_v39 = vadd.f32 %v1501_v17, %v1457_v5  ;;  %v1256_v41 = vpop.f32.mrf.mxu1  ;;  %v1361_v17 = vadd.f32 %v1327_v30, %v1283_v4  ;;  %v1285_v5 = vadd.f32 %v1254_v55, %v2997_v14 }
 0x192   : > { %v1506_v49 = vpop.f32.mrf.mxu0  ;;  %v1561_v45 = vadd.f32 %v3070_v44, %v1541_v39  ;;  %v1332_v33 = vpop.f32.mrf.mxu2 }
 0x193   : > { %v1363_v35 = vadd.f32 %v1332_v33, %v1285_v5 }
 0x194   : > { %v1577_v7 = vmax.f32 %v1561_v45, 0.0 }
 0x195   : > { %v1419_v11 = vpop.f32.mrf.mxu3 }
 0x196   : > { %v1458_v0 = vadd.f32 %v1419_v11, %v1358_v37  ;;  %v2351_v11 = vld [vmem:[%s3289_s6 + $0x20] sm:$0xff] }
 0x197   : > { %1813 = vmatpush.bf16.msra.mxu2 %v2351_v11 }
 0x198   : > { %v1542_v10 = vadd.f32 %v1503_v21, %v1458_v0  ;;  %v1259_v61 = vpop.f32.mrf.mxu1 }
 0x19a   : > { %v1562_v51 = vadd.f32 %v3070_v44, %v1542_v10  ;;  %v1508_v15 = vpop.f32.mrf.mxu0  ;;  %v1334_v46 = vpop.f32.mrf.mxu2  ;;  %v1286_v10 = vadd.f32 %v1256_v41, %v3002_v26 }
 0x19c   : > { %v1578_v1 = vmax.f32 %v1562_v51, 0.0 }
 0x19d   : > { %v1422_v25 = vpop.f32.mrf.mxu3 }
 0x19e   : > { %v1593_v32 = vpack.c.bf16 %v1578_v1, %v1577_v7  ;;  %v1459_v58 = vadd.f32 %v1422_v25, %v1359_v42 }
 0x1a0   : > { %1677 = vmatmul.bf16.vlgmr.msra.gmra.mxu1 %v1593_v32  ;;  %v1543_v63 = vadd.f32 %v1506_v49, %v1459_v58  ;;  %v1261_v57 = vpop.f32.mrf.mxu1  ;;  %v1287_v32 = vadd.f32 %v1259_v61, %v3012_v13 }
 0x1a2   : > { %v1511_v56 = vpop.f32.mrf.mxu0  ;;  %v1563_v20 = vadd.f32 %v3070_v44, %v1543_v63  ;;  %v1337_v37 = vpop.f32.mrf.mxu2 }
 0x1a4   : > { %v1579_v62 = vmax.f32 %v1563_v20, 0.0  ;;  %v1288_v20 = vadd.f32 %v1261_v57, %v3017_v12  ;;  %v2349_v12 = vld [vmem:[%s3289_s6 + $0x10] sm:$0xff] }
 0x1a5   : > { %v1424_v50 = vpop.f32.mrf.mxu3 }
 0x1a6   : > { %v1460_v16 = vadd.f32 %v1424_v50, %v1360_v8  ;;  %v2350_v8 = vld [vmem:[%s3289_s6 + $0x18] sm:$0xff]  ;;  %v1365_v50 = vadd.f32 %v1337_v37, %v1287_v32 }
 0x1a7   : > { %1814 = vmatpush.bf16.msra.mxu2 %v2350_v8 }
 0x1a8   : > { %v1544_v59 = vadd.f32 %v1508_v15, %v1460_v16  ;;  %v1364_v15 = vadd.f32 %v1334_v46, %v1286_v10  ;;  %v1264_v36 = vpop.f32.mrf.mxu1 }
 0x1aa   : > { %v1564_v48 = vadd.f32 %v3070_v44, %v1544_v59  ;;  %v1513_v27 = vpop.f32.mrf.mxu0  ;;  %v1339_v1 = vpop.f32.mrf.mxu2 }
 0x1ab   : > { %v1366_v13 = vadd.f32 %v1339_v1, %v1288_v20  ;;  %1815 = vmatpush.bf16.msra.mxu2 %v2349_v12 }
 0x1ac   : > { %v1580_v60 = vmax.f32 %v1564_v48, 0.0 }
 0x1ad   : > { %v1427_v2 = vpop.f32.mrf.mxu3 }
 0x1ae   : > { %v1594_v31 = vpack.c.bf16 %v1580_v60, %v1579_v62  ;;  %v1461_v9 = vadd.f32 %v1427_v2, %v1361_v17  ;;  %v1289_v17 = vadd.f32 %v1264_v36, %v3028_v53 }
 0x1b0   : > { %1682 = vmatmul.bf16.gmra.mxu1 %v1594_v31  ;;  %v1545_v21 = vadd.f32 %v1511_v56, %v1461_v9  ;;  %v1266_v4 = vpop.f32.mrf.mxu1 }
 0x1b1   : > { %v1290_v61 = vadd.f32 %v1266_v4, %v3033_v43  ;;  %v2448_v4 = vmov 0  }
 0x1b2   : > { %v1516_v23 = vpop.f32.mrf.mxu0  ;;  %v1565_v3 = vadd.f32 %v3070_v44, %v1545_v21  ;;  %v1342_v33 = vpop.f32.mrf.mxu2  ;;  %1859 = vst [vmem:[%s3126_s13] sm:$0xf] %v2448_v4 }
 0x1b3   : > { %1860 = vst [vmem:[%s3126_s13 + $0x4] sm:$0xf] %v2448_v4 }
 0x1b4   : > { %v1581_v39 = vmax.f32 %v1565_v3, 0.0  ;;  %1861 = vst [vmem:[%s3126_s13 + $0x8] sm:$0xf] %v2448_v4 }
 0x1b5   : > { %v1429_v38 = vpop.f32.mrf.mxu3  ;;  %1862 = vst [vmem:[%s3126_s13 + $0xc] sm:$0xf] %v2448_v4 }
 0x1b6   : > { %v1462_v22 = vadd.f32 %v1429_v38, %v1362_v18  ;;  %1863 = vst [vmem:[%s3126_s13 + $0x10] sm:$0xf] %v2448_v4 }
 0x1b7   : > { %1864 = vst [vmem:[%s3126_s13 + $0x14] sm:$0xf] %v2448_v4 }
 0x1b8   : > { %v1546_v34 = vadd.f32 %v1513_v27, %v1462_v22  ;;  %v1269_v18 = vpop.f32.mrf.mxu1  ;;  %1865 = vst [vmem:[%s3126_s13 + $0x18] sm:$0xf] %v2448_v4 }
 0x1b9   : > { %v1291_v11 = vadd.f32 %v1269_v18, %v3046_v28  ;;  %v2347_v28 = vld [vmem:[%s3289_s6] sm:$0xff]  ;;  %1866 = vst [vmem:[%s3126_s13 + $0x1c] sm:$0xf] %v2448_v4 }
 0x1ba   : > { %v1566_v49 = vadd.f32 %v3070_v44, %v1546_v34  ;;  %v1518_v30 = vpop.f32.mrf.mxu0  ;;  %v1344_v2 = vpop.f32.mrf.mxu2  ;;  %1867 = vst [vmem:[%s3126_s13 + $0x20] sm:$0xf] %v2448_v4 }
 0x1bb   : > { %v1368_v3 = vadd.f32 %v1344_v2, %v1290_v61  ;;  %1868 = vst [vmem:[%s3126_s13 + $0x24] sm:$0xf] %v2448_v4 }
 0x1bc   : > { %v1582_v6 = vmax.f32 %v1566_v49, 0.0  ;;  %1869 = vst [vmem:[%s3126_s13 + $0x28] sm:$0xf] %v2448_v4 }
 0x1bd   : > { %v1432_v0 = vpop.f32.mrf.mxu3  ;;  %1870 = vst [vmem:[%s3126_s13 + $0x2c] sm:$0xf] %v2448_v4 }
 0x1be   : > { %v1595_v45 = vpack.c.bf16 %v1582_v6, %v1581_v39  ;;  %v1463_v51 = vadd.f32 %v1432_v0, %v1363_v35  ;;  %1871 = vst [vmem:[%s3126_s13 + $0x30] sm:$0xf] %v2448_v4 }
 0x1bf   : > { %1872 = vst [vmem:[%s3126_s13 + $0x34] sm:$0xf] %v2448_v4 }
 0x1c0   : > { %1687 = vmatmul.bf16.gmra.mxu1 %v1595_v45  ;;  %v1547_v7 = vadd.f32 %v1516_v23, %v1463_v51  ;;  %v1367_v23 = vadd.f32 %v1342_v33, %v1289_v17  ;;  %v2348_v45 = vld [vmem:[%s3289_s6 + $0x8] sm:$0xff]  ;;  %1873 = vst [vmem:[%s3126_s13 + $0x38] sm:$0xf] %v2448_v4 }
 0x1c1   : > { %1816 = vmatpush.bf16.msra.mxu2 %v2348_v45  ;;  %1874 = vst [vmem:[%s3126_s13 + $0x3c] sm:$0xf] %v2448_v4 }
 0x1c2   : > { %v1521_v14 = vpop.f32.mrf.mxu0  ;;  %v1567_v25 = vadd.f32 %v3070_v44, %v1547_v7  ;;  %v1347_v53 = vpop.f32.mrf.mxu2 }
 0x1c3   : > { %v1369_v51 = vadd.f32 %v1347_v53, %v1291_v11 }
 0x1c4   : > { %v1583_v56 = vmax.f32 %v1567_v25, 0.0 }
 0x1c5   : > { %v1434_v24 = vpop.f32.mrf.mxu3  ;;  %1817 = vmatpush.bf16.msra.mxu2 %v2347_v28 }
 0x1c6   : > { %v1464_v52 = vadd.f32 %v1434_v24, %v1364_v15 }
 0x1c8   : > { %v1548_v42 = vadd.f32 %v1518_v30, %v1464_v52  ;;  %v1271_v30 = vpop.f32.mrf.mxu1 }
 0x1c9   : > { %v1292_v15 = vadd.f32 %v1271_v30, %v3053_v40 }
 0x1ca   : > { %v1568_v58 = vadd.f32 %v3070_v44, %v1548_v42  ;;  %v1523_v55 = vpop.f32.mrf.mxu0  ;;  %v1349_v10 = vpop.f32.mrf.mxu2 }
 0x1cb   : > { %v1370_v52 = vadd.f32 %v1349_v10, %v1292_v15 }
 0x1cc   : > { %v1584_v26 = vmax.f32 %v1568_v58, 0.0 }
 0x1cd   : > { %v1437_v63 = vpop.f32.mrf.mxu3 }
 0x1ce   : > { %v1596_v16 = vpack.c.bf16 %v1584_v26, %v1583_v56  ;;  %v1465_v59 = vadd.f32 %v1437_v63, %v1365_v50 }
 0x1d0   : > { %1692 = vmatmul.bf16.gmra.mxu1 %v1596_v16  ;;  %v1549_v48 = vadd.f32 %v1521_v14, %v1465_v59  ;;  %v1274_v1 = vpop.f32.mrf.mxu1 }
 0x1d1   : > { %v1293_v40 = vadd.f32 %v1274_v1, %v3057_v47 }
 0x1d2   : > { %v1526_v41 = vpop.f32.mrf.mxu0  ;;  %v1569_v60 = vadd.f32 %v3070_v44, %v1549_v48  ;;  %v1352_v36 = vpop.f32.mrf.mxu2 }
 0x1d3   : > { %v1371_v33 = vadd.f32 %v1352_v36, %v1293_v40 }
 0x1d4   : > { %v1585_v29 = vmax.f32 %v1569_v60, 0.0 }
 0x1d5   : > { %v1439_v27 = vpop.f32.mrf.mxu3 }
 0x1d6   : > { %v1466_v62 = vadd.f32 %v1439_v27, %v1366_v13 }
 0x1d8   : > { %v1550_v54 = vadd.f32 %v1523_v55, %v1466_v62  ;;  %v1276_v26 = vpop.f32.mrf.mxu1 }
 0x1d9   : > { %v1294_v59 = vadd.f32 %v1276_v26, %v3060_v19 }
 0x1da   : > { %v1570_v31 = vadd.f32 %v3070_v44, %v1550_v54  ;;  %v1528_v38 = vpop.f32.mrf.mxu0  ;;  %v1354_v47 = vpop.f32.mrf.mxu2 }
 0x1db   : > { %v1372_v19 = vadd.f32 %v1354_v47, %v1294_v59 }
 0x1dc   : > { %v1586_v9 = vmax.f32 %v1570_v31, 0.0 }
 0x1dd   : > { %v1442_v46 = vpop.f32.mrf.mxu3 }
 0x1de   : > { %v1597_v21 = vpack.c.bf16 %v1586_v9, %v1585_v29  ;;  %v1467_v22 = vadd.f32 %v1442_v46, %v1367_v23  ;;  %v3149_v9 = vld [vmem:[%s3288_s5] ss:$0 sm:$0xff] }
 0x1e0   : > { %1697 = vmatmul.bf16.gmra.mxu1 %v1597_v21  ;;  %v1551_v34 = vadd.f32 %v1526_v41, %v1467_v22 }
 0x1e2   : > { %v1571_v37 = vadd.f32 %v3070_v44, %v1551_v34  ;;  %v1531_v6 = vpop.f32.mrf.mxu0 }
 0x1e4   : > { %v1587_v35 = vmax.f32 %v1571_v37, 0.0 }
 0x1e5   : > { %v1444_v5 = vpop.f32.mrf.mxu3 }
 0x1e6   : > { %v1468_v49 = vadd.f32 %v1444_v5, %v1368_v3 }
 0x1e8   : > { %v1552_v39 = vadd.f32 %v1528_v38, %v1468_v49 }
 0x1ea   : > { %v1572_v0 = vadd.f32 %v3070_v44, %v1552_v39  ;;  %v1533_v24 = vpop.f32.mrf.mxu0 }
 0x1ec   : > { %v1588_v43 = vmax.f32 %v1572_v0, 0.0 }
 0x1ed   : > { %v1447_v57 = vpop.f32.mrf.mxu3 }
 0x1ee   : > { %v1598_v14 = vpack.c.bf16 %v1588_v43, %v1587_v35  ;;  %v1469_v7 = vadd.f32 %v1447_v57, %v1369_v51 }
 0x1f0   : > { %1702 = vmatmul.bf16.gmra.mxu1 %v1598_v14  ;;  %v1553_v25 = vadd.f32 %v1531_v6, %v1469_v7 }
 0x1f2   : > { %v1573_v58 = vadd.f32 %v3070_v44, %v1553_v25  ;;  %v1536_v50 = vpop.f32.mrf.mxu0 }
 0x1f4   : > { %v1589_v8 = vmax.f32 %v1573_v58, 0.0 }
 0x1f5   : > { %v1449_v42 = vpop.f32.mrf.mxu3 }
 0x1f6   : > { %v1470_v32 = vadd.f32 %v1449_v42, %v1370_v52 }
 0x1f8   : > { %v1554_v55 = vadd.f32 %v1533_v24, %v1470_v32 }
 0x1fa   : > { %v1574_v56 = vadd.f32 %v3070_v44, %v1554_v55  ;;  %v1538_v62 = vpop.f32.mrf.mxu0 }
 0x1fc   : > { %v1590_v63 = vmax.f32 %v1574_v56, 0.0 }
 0x1fd   : > { %v1452_v16 = vpop.f32.mrf.mxu3 }
 0x1fe   : > { %v1599_v20 = vpack.c.bf16 %v1590_v63, %v1589_v8  ;;  %v1471_v13 = vadd.f32 %v1452_v16, %v1371_v33 }
 0x200   : > { %1707 = vmatmul.bf16.gmra.mxu1 %v1599_v20  ;;  %v1555_v48 = vadd.f32 %v1536_v50, %v1471_v13 }
 0x202   : > { %v1575_v60 = vadd.f32 %v3070_v44, %v1555_v48 }
 0x204   : > { %v1591_v17 = vmax.f32 %v1575_v60, 0.0 }
 0x205   : > { %v1454_v27 = vpop.f32.mrf.mxu3 }
 0x206   : > { %v1472_v41 = vadd.f32 %v1454_v27, %v1372_v19 }
 0x208   : > { %v1556_v54 = vadd.f32 %v1538_v62, %v1472_v41 }
 0x20a   : > { %v1576_v2 = vadd.f32 %v3070_v44, %v1556_v54 }
 0x20c   : > { %v1592_v31 = vmax.f32 %v1576_v2, 0.0 }
 0x20e   : > { %v1600_v29 = vpack.c.bf16 %v1592_v31, %v1591_v17 }
 0x210   : > { %1712 = vmatmul.bf16.gmra.mxu1 %v1600_v29 }
 0x21d   : > { %v1678_v44 = vpop.f32.mrf.mxu1 }
 0x21e   : > { %v1679_v12 = vadd.f32 %v3149_v9, %v1678_v44 }
 0x220   : > { %v1718_v46 = vmax.f32 %v1679_v12, 0.0 }
 0x222   : > { %v1875_v23 = vpack.c.bf16 %v1718_v46, %v1718_v46 }
 0x224   : > { %1892 = vst.msk [vmem:[%s3126_s13] sm:$0xf] %vm1891_vm8, %v1875_v23 }
 0x225   : > { %v1680_v18 = vpop.f32.mrf.mxu1 }
 0x226   : > { %v1681_v21 = vadd.f32 %v3149_v9, %v1680_v18 }
 0x228   : > { %v1719_v38 = vmax.f32 %v1681_v21, 0.0 }
 0x22a   : > { %v1734_v61 = vpack.c.bf16 %v1719_v38, %v1718_v46  ;;  %v1876_v22 = vpack.c.bf16 %v1719_v38, %v1719_v38 }
 0x22c   : > { %1818 = vmatmul.bf16.vlgmr.msra.gmra.mxu2 %v1734_v61  ;;  %1893 = vst.msk [vmem:[%s3126_s13 + $0x4] sm:$0xf] %vm1891_vm8, %v1876_v22 }
 0x22d   : > { %v1683_v53 = vpop.f32.mrf.mxu1 }
 0x22e   : > { %v1684_v3 = vadd.f32 %v3149_v9, %v1683_v53  ;;  %v3202_v53 = vld [vmem:[%s3290_s7] ss:$0 sm:$0xff] }
 0x230   : > { %v1720_v34 = vmax.f32 %v1684_v3, 0.0 }
 0x232   : > { %v1877_v5 = vpack.c.bf16 %v1720_v34, %v1720_v34 }
 0x234   : > { %1894 = vst.msk [vmem:[%s3126_s13 + $0x8] sm:$0xf] %vm1891_vm8, %v1877_v5 }
 0x235   : > { %v1685_v49 = vpop.f32.mrf.mxu1 }
 0x236   : > { %v1686_v30 = vadd.f32 %v3149_v9, %v1685_v49 }
 0x238   : > { %v1721_v37 = vmax.f32 %v1686_v30, 0.0 }
 0x23a   : > { %v1735_v39 = vpack.c.bf16 %v1721_v37, %v1720_v34  ;;  %v1878_v6 = vpack.c.bf16 %v1721_v37, %v1721_v37 }
 0x23c   : > { %1823 = vmatmul.bf16.gmra.mxu2 %v1735_v39  ;;  %1895 = vst.msk [vmem:[%s3126_s13 + $0xc] sm:$0xf] %vm1891_vm8, %v1878_v6 }
 0x23d   : > { %v1688_v11 = vpop.f32.mrf.mxu1 }
 0x23e   : > { %v1689_v0 = vadd.f32 %v3149_v9, %v1688_v11 }
 0x240   : > { %v1722_v35 = vmax.f32 %v1689_v0, 0.0 }
 0x242   : > { %v1879_v43 = vpack.c.bf16 %v1722_v35, %v1722_v35 }
 0x244   : > { %1896 = vst.msk [vmem:[%s3126_s13 + $0x10] sm:$0xf] %vm1891_vm8, %v1879_v43 }
 0x245   : > { %v1690_v45 = vpop.f32.mrf.mxu1 }
 0x246   : > { %v1691_v10 = vadd.f32 %v3149_v9, %v1690_v45 }
 0x248   : > { %v1723_v57 = vmax.f32 %v1691_v10, 0.0 }
 0x24a   : > { %v1736_v51 = vpack.c.bf16 %v1723_v57, %v1722_v35  ;;  %v1880_v14 = vpack.c.bf16 %v1723_v57, %v1723_v57 }
 0x24c   : > { %1828 = vmatmul.bf16.gmra.mxu2 %v1736_v51  ;;  %1897 = vst.msk [vmem:[%s3126_s13 + $0x14] sm:$0xf] %vm1891_vm8, %v1880_v14 }
 0x24d   : > { %v1693_v15 = vpop.f32.mrf.mxu1 }
 0x24e   : > { %v1694_v7 = vadd.f32 %v3149_v9, %v1693_v15 }
 0x250   : > { %v1724_v28 = vmax.f32 %v1694_v7, 0.0 }
 0x252   : > { %v1881_v1 = vpack.c.bf16 %v1724_v28, %v1724_v28 }
 0x254   : > { %1898 = vst.msk [vmem:[%s3126_s13 + $0x18] sm:$0xf] %vm1891_vm8, %v1881_v1 }
 0x255   : > { %v1695_v24 = vpop.f32.mrf.mxu1 }
 0x256   : > { %v1696_v52 = vadd.f32 %v3149_v9, %v1695_v24 }
 0x258   : > { %v1725_v25 = vmax.f32 %v1696_v52, 0.0 }
 0x25a   : > { %v1737_v42 = vpack.c.bf16 %v1725_v25, %v1724_v28  ;;  %v1882_v32 = vpack.c.bf16 %v1725_v25, %v1725_v25 }
 0x25c   : > { %1833 = vmatmul.bf16.gmra.mxu2 %v1737_v42  ;;  %1899 = vst.msk [vmem:[%s3126_s13 + $0x1c] sm:$0xf] %vm1891_vm8, %v1882_v32 }
 0x25d   : > { %v1698_v36 = vpop.f32.mrf.mxu1 }
 0x25e   : > { %v1699_v58 = vadd.f32 %v3149_v9, %v1698_v36 }
 0x260   : > { %v1726_v55 = vmax.f32 %v1699_v58, 0.0 }
 0x262   : > { %v1883_v40 = vpack.c.bf16 %v1726_v55, %v1726_v55 }
 0x264   : > { %1900 = vst.msk [vmem:[%s3126_s13 + $0x20] sm:$0xf] %vm1891_vm8, %v1883_v40 }
 0x265   : > { %v1700_v56 = vpop.f32.mrf.mxu1 }
 0x266   : > { %v1701_v26 = vadd.f32 %v3149_v9, %v1700_v56 }
 0x268   : > { %v1727_v8 = vmax.f32 %v1701_v26, 0.0 }
 0x26a   : > { %v1738_v63 = vpack.c.bf16 %v1727_v8, %v1726_v55  ;;  %v1884_v50 = vpack.c.bf16 %v1727_v8, %v1727_v8 }
 0x26c   : > { %1838 = vmatmul.bf16.gmra.mxu2 %v1738_v63  ;;  %1901 = vst.msk [vmem:[%s3126_s13 + $0x24] sm:$0xf] %vm1891_vm8, %v1884_v50 }
 0x26d   : > { %v1703_v16 = vpop.f32.mrf.mxu1 }
 0x26e   : > { %v1704_v33 = vadd.f32 %v3149_v9, %v1703_v16 }
 0x270   : > { %v1728_v20 = vmax.f32 %v1704_v33, 0.0 }
 0x272   : > { %v1885_v59 = vpack.c.bf16 %v1728_v20, %v1728_v20 }
 0x274   : > { %1902 = vst.msk [vmem:[%s3126_s13 + $0x28] sm:$0xf] %vm1891_vm8, %v1885_v59 }
 0x275   : > { %v1705_v13 = vpop.f32.mrf.mxu1 }
 0x276   : > { %v1706_v47 = vadd.f32 %v3149_v9, %v1705_v13 }
 0x278   : > { %v1729_v4 = vmax.f32 %v1706_v47, 0.0 }
 0x27a   : > { %v1739_v19 = vpack.c.bf16 %v1729_v4, %v1728_v20  ;;  %v1886_v48 = vpack.c.bf16 %v1729_v4, %v1729_v4 }
 0x27c   : > { %1843 = vmatmul.bf16.gmra.mxu2 %v1739_v19  ;;  %1903 = vst.msk [vmem:[%s3126_s13 + $0x2c] sm:$0xf] %vm1891_vm8, %v1886_v48 }
 0x27d   : > { %v1708_v27 = vpop.f32.mrf.mxu1 }
 0x27e   : > { %v1709_v41 = vadd.f32 %v3149_v9, %v1708_v27 }
 0x280   : > { %v1730_v62 = vmax.f32 %v1709_v41, 0.0 }
 0x282   : > { %v1887_v60 = vpack.c.bf16 %v1730_v62, %v1730_v62 }
 0x284   : > { %1904 = vst.msk [vmem:[%s3126_s13 + $0x30] sm:$0xf] %vm1891_vm8, %v1887_v60 }
 0x285   : > { %v1710_v54 = vpop.f32.mrf.mxu1 }
 0x286   : > { %v1711_v2 = vadd.f32 %v3149_v9, %v1710_v54 }
 0x288   : > { %v1731_v17 = vmax.f32 %v1711_v2, 0.0 }
 0x28a   : > { %v1740_v31 = vpack.c.bf16 %v1731_v17, %v1730_v62  ;;  %v1888_v29 = vpack.c.bf16 %v1731_v17, %v1731_v17 }
 0x28c   : > { %1848 = vmatmul.bf16.gmra.mxu2 %v1740_v31  ;;  %1905 = vst.msk [vmem:[%s3126_s13 + $0x34] sm:$0xf] %vm1891_vm8, %v1888_v29 }
 0x28d   : > { %v1713_v44 = vpop.f32.mrf.mxu1 }
 0x28e   : > { %v1714_v12 = vadd.f32 %v3149_v9, %v1713_v44 }
 0x290   : > { %v1732_v46 = vmax.f32 %v1714_v12, 0.0 }
 0x292   : > { %v1889_v23 = vpack.c.bf16 %v1732_v46, %v1732_v46 }
 0x294   : > { %1906 = vst.msk [vmem:[%s3126_s13 + $0x38] sm:$0xf] %vm1891_vm8, %v1889_v23 }
 0x295   : > { %v1715_v18 = vpop.f32.mrf.mxu1 }
 0x296   : > { %v1716_v21 = vadd.f32 %v3149_v9, %v1715_v18 }
 0x298   : > { %v1733_v38 = vmax.f32 %v1716_v21, 0.0 }
 0x29a   : > { %v1741_v61 = vpack.c.bf16 %v1733_v38, %v1732_v46  ;;  %v1890_v22 = vpack.c.bf16 %v1733_v38, %v1733_v38 }
 0x29c   : > { %1853 = vmatmul.bf16.gmra.mxu2 %v1741_v61  ;;  %1907 = vst.msk [vmem:[%s3126_s13 + $0x3c] sm:$0xf] %vm1891_vm8, %v1890_v22 }
 0x2af   : > { %v1819_v3 = vpop.f32.mrf.mxu2 }
 0x2b0   : > { %v1820_v34 = vadd.f32 %v3202_v53, %v1819_v3 }
 0x2b2   : > { %v1908_v5 = vpack.c.bf16 %v1820_v34, %v1820_v34 }
 0x2b4   : > { %1940 = vrot.lane.b32.xlu0 %v1908_v5, %s2449_s19 }
 0x2b7   : > { %v1821_v49 = vpop.f32.mrf.mxu2 }
 0x2b8   : > { %v1822_v9 = vadd.f32 %v3202_v53, %v1821_v49 }
 0x2ba   : > { %v1909_v30 = vpack.c.bf16 %v1822_v9, %v1822_v9 }
 0x2bc   : > { %1942 = vrot.lane.b32.xlu0 %v1909_v30, %s2449_s19 }
 0x2bf   : > { %v1824_v37 = vpop.f32.mrf.mxu2 }
 0x2c0   : > { %v1825_v39 = vadd.f32 %v3202_v53, %v1824_v37 }
 0x2c2   : > { %v1910_v6 = vpack.c.bf16 %v1825_v39, %v1825_v39 }
 0x2c4   : > { %1944 = vrot.lane.b32.xlu1 %v1910_v6, %s2449_s19 }
 0x2c7   : > { %v1826_v11 = vpop.f32.mrf.mxu2 }
 0x2c8   : > { %v1827_v0 = vadd.f32 %v3202_v53, %v1826_v11 }
 0x2ca   : > { %v1911_v35 = vpack.c.bf16 %v1827_v0, %v1827_v0 }
 0x2cc   : > { %1946 = vrot.lane.b32.xlu1 %v1911_v35, %s2449_s19 }
 0x2cf   : > { %v1829_v43 = vpop.f32.mrf.mxu2 }
 0x2d0   : > { %v1830_v45 = vadd.f32 %v3202_v53, %v1829_v43 }
 0x2d2   : > { %v1912_v10 = vpack.c.bf16 %v1830_v45, %v1830_v45 }
 0x2d4   : > { %1948 = vrot.lane.b32.xlu2 %v1912_v10, %s2449_s19 }
 0x2d7   : > { %v1831_v57 = vpop.f32.mrf.mxu2 }
 0x2d8   : > { %v1832_v51 = vadd.f32 %v3202_v53, %v1831_v57 }
 0x2da   : > { %v1913_v14 = vpack.c.bf16 %v1832_v51, %v1832_v51 }
 0x2dc   : > { %1950 = vrot.lane.b32.xlu2 %v1913_v14, %s2449_s19 }
 0x2df   : > { %v1834_v15 = vpop.f32.mrf.mxu2 }
 0x2e0   : > { %v1835_v7 = vadd.f32 %v3202_v53, %v1834_v15 }
 0x2e2   : > { %v1914_v28 = vpack.c.bf16 %v1835_v7, %v1835_v7 }
 0x2e4   : > { %1952 = vrot.lane.b32.xlu0 %v1914_v28, %s2449_s19 }
 0x2e7   : > { %v1836_v1 = vpop.f32.mrf.mxu2 }
 0x2e8   : > { %v1837_v24 = vadd.f32 %v3202_v53, %v1836_v1 }
 0x2ea   : > { %v1915_v52 = vpack.c.bf16 %v1837_v24, %v1837_v24 }
 0x2ec   : > { %1954 = vrot.lane.b32.xlu1 %v1915_v52, %s2449_s19 }
 0x2ef   : > { %v1839_v25 = vpop.f32.mrf.mxu2 }
 0x2f0   : > { %v1840_v42 = vadd.f32 %v3202_v53, %v1839_v25 }
 0x2f2   : > { %v1916_v32 = vpack.c.bf16 %v1840_v42, %v1840_v42 }
 0x2f4   : > { %1956 = vrot.lane.b32.xlu2 %v1916_v32, %s2449_s19 }
 0x2f7   : > { %v1841_v36 = vpop.f32.mrf.mxu2 }
 0x2f8   : > { %v1842_v58 = vadd.f32 %v3202_v53, %v1841_v36 }
 0x2fa   : > { %v1917_v55 = vpack.c.bf16 %v1842_v58, %v1842_v58 }
 0x2fc   : > { %1958 = vrot.lane.b32.xlu0 %v1917_v55, %s2449_s19 }
 0x2ff   : > { %v1844_v40 = vpop.f32.mrf.mxu2 }
 0x300   : > { %v1845_v56 = vadd.f32 %v3202_v53, %v1844_v40 }
 0x302   : > { %v1918_v26 = vpack.c.bf16 %v1845_v56, %v1845_v56 }
 0x304   : > { %1960 = vrot.lane.b32.xlu1 %v1918_v26, %s2449_s19 }
 0x307   : > { %v1846_v8 = vpop.f32.mrf.mxu2 }
 0x308   : > { %v1847_v63 = vadd.f32 %v3202_v53, %v1846_v8 }
 0x30a   : > { %v1919_v50 = vpack.c.bf16 %v1847_v63, %v1847_v63 }
 0x30c   : > { %1962 = vrot.lane.b32.xlu2 %v1919_v50, %s2449_s19 }
 0x30f   : > { %v1849_v16 = vpop.f32.mrf.mxu2 }
 0x310   : > { %v1850_v33 = vadd.f32 %v3202_v53, %v1849_v16 }
 0x312   : > { %v1920_v20 = vpack.c.bf16 %v1850_v33, %v1850_v33 }
 0x314   : > { %1964 = vrot.lane.b32.xlu0 %v1920_v20, %s2449_s19 }
 0x317   : > { %v1851_v59 = vpop.f32.mrf.mxu2 }
 0x318   : > { %v1852_v13 = vadd.f32 %v3202_v53, %v1851_v59 }
 0x31a   : > { %v1921_v47 = vpack.c.bf16 %v1852_v13, %v1852_v13 }
 0x31c   : > { %1966 = vrot.lane.b32.xlu1 %v1921_v47, %s2449_s19 }
 0x31f   : > { %v1854_v4 = vpop.f32.mrf.mxu2 }
 0x320   : > { %v1855_v19 = vadd.f32 %v3202_v53, %v1854_v4 }
 0x322   : > { %v1922_v48 = vpack.c.bf16 %v1855_v19, %v1855_v19 }
 0x324   : > { %1968 = vrot.lane.b32.xlu2 %v1922_v48, %s2449_s19 }
 0x326   : > { %v1941_v27 = vpop.permute.xlu0 %1940 }
 0x327   : > { %1989 = vst.msk [vmem:[%s3126_s13] sm:$0xf] %vm1988_vm9, %v1941_v27  ;;  %v1856_v41 = vpop.f32.mrf.mxu2 }
 0x328   : > { %v1857_v62 = vadd.f32 %v3202_v53, %v1856_v41 }
 0x32a   : > { %v1923_v60 = vpack.c.bf16 %v1857_v62, %v1857_v62 }
 0x32c   : > { %1970 = vrot.lane.b32.xlu0 %v1923_v60, %s2449_s19 }
 0x32e   : > { %v1943_v54 = vpop.permute.xlu0 %1942  ;;  %v1949_v2 = vpop.permute.xlu2 %1948 }
 0x32f   : > { %1990 = vst.msk [vmem:[%s3126_s13 + $0x4] sm:$0xf] %vm1988_vm9, %v1943_v54 }
 0x330   : > { %1993 = vst.msk [vmem:[%s3126_s13 + $0x10] sm:$0xf] %vm1988_vm9, %v1949_v2 }
 0x336   : > { %v1945_v17 = vpop.permute.xlu1 %1944  ;;  %v1951_v31 = vpop.permute.xlu2 %1950 }
 0x337   : > { %1991 = vst.msk [vmem:[%s3126_s13 + $0x8] sm:$0xf] %vm1988_vm9, %v1945_v17 }
 0x338   : > { %1994 = vst.msk [vmem:[%s3126_s13 + $0x14] sm:$0xf] %vm1988_vm9, %v1951_v31 }
 0x33e   : > { %v1947_v29 = vpop.permute.xlu1 %1946 }
 0x33f   : > { %1992 = vst.msk [vmem:[%s3126_s13 + $0xc] sm:$0xf] %vm1988_vm9, %v1947_v29 }
 0x34e   : > { %v1957_v44 = vpop.permute.xlu2 %1956 }
 0x34f   : > { %1997 = vst.msk [vmem:[%s3126_s13 + $0x20] sm:$0xf] %vm1988_vm9, %v1957_v44 }
 0x356   : > { %v1953_v12 = vpop.permute.xlu0 %1952 }
 0x357   : > { %1995 = vst.msk [vmem:[%s3126_s13 + $0x18] sm:$0xf] %vm1988_vm9, %v1953_v12 }
 0x35e   : > { %v1955_v46 = vpop.permute.xlu1 %1954 }
 0x35f   : > { %1996 = vst.msk [vmem:[%s3126_s13 + $0x1c] sm:$0xf] %vm1988_vm9, %v1955_v46 }
 0x366   : > { %v1963_v23 = vpop.permute.xlu2 %1962 }
 0x367   : > { %2000 = vst.msk [vmem:[%s3126_s13 + $0x2c] sm:$0xf] %vm1988_vm9, %v1963_v23 }
 0x36e   : > { %v1959_v18 = vpop.permute.xlu0 %1958 }
 0x36f   : > { %1998 = vst.msk [vmem:[%s3126_s13 + $0x24] sm:$0xf] %vm1988_vm9, %v1959_v18 }
 0x376   : > { %v1961_v21 = vpop.permute.xlu1 %1960 }
 0x377   : > { %1999 = vst.msk [vmem:[%s3126_s13 + $0x28] sm:$0xf] %vm1988_vm9, %v1961_v21 }
 0x37e   : > { %v1969_v38 = vpop.permute.xlu2 %1968 }
 0x37f   : > { %2003 = vst.msk [vmem:[%s3126_s13 + $0x38] sm:$0xf] %vm1988_vm9, %v1969_v38 }
 0x386   : > { %v1965_v61 = vpop.permute.xlu0 %1964 }
 0x387   : > { %2001 = vst.msk [vmem:[%s3126_s13 + $0x30] sm:$0xf] %vm1988_vm9, %v1965_v61 }
 0x38e   : > { %v1967_v22 = vpop.permute.xlu1 %1966 }
 0x38f   : > { %2002 = vst.msk [vmem:[%s3126_s13 + $0x34] sm:$0xf] %vm1988_vm9, %v1967_v22 }
 0x39e   : > { %v1971_v53 = vpop.permute.xlu0 %1970 }
 0x39f   : > { %2004 = vst.msk [vmem:[%s3126_s13 + $0x3c] sm:$0xf] %vm1988_vm9, %v1971_v53 }
 0x3a0 PF: > { %s18_s9 = sadd.s32 1, %s2446_s9   ;;  %s3296_s27 = smov %s2438_s29 }
 0x3a1   : > { %p15_p9 = scmp.ge.s32.totalorder %s18_s9, 6   ;;  %s3297_s28 = smov %s2442_s30 }
 0x3a2   : > { %s3298_s29 = smov %s3301_s10  ;;  %s3299_s30 = smov %s3305_s11 }
 0x3a3   :  { %17 = sbr.rel (!%p15_p9) target bundleno = 3 (0x3), region = 93 }

</bundles_post_ra>
